<compile_context>
chip_gen: v5e
topology: v5e:2x2
jax: 0.10.0
libtpu: 0.0.40
codegen_flags: <defaults>
</compile_context>

<pallas_src>
import jax
import jax.numpy as jnp
import numpy as np
from jax.experimental import pallas as pl
from jax.experimental.pallas import tpu as pltpu

HIDDEN = 32          # hidden
NODE_FEAT = 16       # Node_feature_dim
AXIS_FEAT = 8        # Axis_feature_dim
SPLIT_PARTS = 4      # len(possible_split_parts)
OUT_PAD = 128        # lane-dense output width
NEG_BIG = -1e30      # softmax padding logit


def _vmem():
    return pl.BlockSpec(memory_space=pltpu.MemorySpace.VMEM)


# ----------------------------------------------------------------------------
# In-kernel cell math (operates on plain jnp arrays loaded from VMEM refs)
# ----------------------------------------------------------------------------
def _gru_cell(x, h, wx, wh, wth, b):
    """Row-wise GRU-style cell, shared by AxisCell and single-child NodeCell.

    x: (B, F), h: (B, H).
    wx: (F, 3H) = [Wr_x | Wz_x | Wt_x]   wh: (H, 2H) = [Wr_h | Wz_h]
    wth: (H, H) (trans h-side)           b: (1, 3H) = [br | bz | bt]
    """
    gx = jnp.dot(x, wx, preferred_element_type=jnp.float32)      # (B, 3H)
    gh = jnp.dot(h, wh, preferred_element_type=jnp.float32)      # (B, 2H)
    act = jax.nn.sigmoid(gx[:, :2 * HIDDEN] + gh + b[:, :2 * HIDDEN])
    r = act[:, :HIDDEN]
    z = act[:, HIDDEN:]
    trans = jnp.tanh(gx[:, 2 * HIDDEN:] + b[:, 2 * HIDDEN:]
                     + jnp.dot(r * h, wth, preferred_element_type=jnp.float32))
    return (1.0 - z) * h + z * trans


def _node_cell(x, ch, wx, wh, wth, b):
    """NodeCell over N children. x: (1, F), ch: (N, H)."""
    num = ch.shape[0]
    inv = 1.0 / num
    hbar = jnp.sum(ch, axis=0, keepdims=True) * inv               # (1, H)
    gx = jnp.dot(x, wx, preferred_element_type=jnp.float32)       # (1, 3H)
    gh = jnp.dot(hbar, wh, preferred_element_type=jnp.float32)    # (1, 2H)
    act = jax.nn.sigmoid(gx[:, :2 * HIDDEN] + gh + b[:, :2 * HIDDEN])
    r = act[:, :HIDDEN]
    z = act[:, HIDDEN:]
    trans = jnp.tanh(gx[:, 2 * HIDDEN:] + b[:, 2 * HIDDEN:]
                     + jnp.dot(r * ch, wth, preferred_element_type=jnp.float32))  # (N, H)
    return jnp.sum((1.0 - z) * ch + z * trans, axis=0, keepdims=True) * inv


# ----------------------------------------------------------------------------
# Fully fused forward kernel (one pallas_call for the whole demo graph)
# ----------------------------------------------------------------------------
def agent_fused_kernel(
        x_leaf_ref, op_x_ref, x_ax_ref, f_rd_ref, others_ref,
        nwx_ref, nwh_ref, nwth_ref, nb_ref,
        awx_ref, awh_ref, awth_ref, ab_ref,
        rwx_ref, rwh_ref, rwth_ref, rb_ref,
        wtu_ref, wtd_ref, btp_ref, wdh_ref, wdo_ref, bdp_ref,
        out_ref):
    # Load every weight exactly once (stays resident in VMEM for the call).
    node_w = (nwx_ref[...], nwh_ref[...], nwth_ref[...], nb_ref[...])
    axis_w = (awx_ref[...], awh_ref[...], awth_ref[...], ab_ref[...])
    raxis_w = (rwx_ref[...], rwh_ref[...], rwth_ref[...], rb_ref[...])

    # Leaf NodeCells (down-sweep producer + up-sweep consumer), batched M=2,
    # each with a single zero child (NodeCell with one child == GRU form).
    zeros2 = jnp.zeros((2, HIDDEN), jnp.float32)
    leaves = _gru_cell(x_leaf_ref[...], zeros2, *node_w)   # row0 down_parent, row1 up_child

    # Spatial + up AxisCells share the _axis_cell weights -> batched M=2.
    ax = _gru_cell(x_ax_ref[...], leaves, *axis_w)         # row0 a_spatial, row1 a_up

    # Reduce AxisCell (its own weights), h = down_parent.
    a_rd = _gru_cell(f_rd_ref[...], leaves[0:1, :], *raxis_w)   # (1, H)

    # Op-level NodeCells.
    op_x = op_x_ref[...]
    down_op = _node_cell(op_x, jnp.concatenate([ax[0:1, :], a_rd], axis=0), *node_w)
    up_op = _gru_cell(op_x, ax[1:2, :], *node_w)           # single child -> GRU form

    # Head: last_h = relu(W_trans [up, down]); decider logits over a
    # lane-padded (1, 128) slab (padding columns are zero-weight / -1e30 bias).
    last_h = jnp.maximum(
        jnp.dot(up_op, wtu_ref[...], preferred_element_type=jnp.float32)
        + jnp.dot(down_op, wtd_ref[...], preferred_element_type=jnp.float32)
        + btp_ref[...], 0.0)                                # (1, 128); lanes >= H are 0
    logits = (jnp.dot(last_h, wdh_ref[...], preferred_element_type=jnp.float32)
              + jnp.dot(others_ref[...], wdo_ref[...], preferred_element_type=jnp.float32)
              + bdp_ref[...])                               # (1, 128); pad lanes ~ -1e30
    m = jnp.max(logits, axis=-1, keepdims=True)
    e = jnp.exp(logits - m)
    probs = e * pl.reciprocal(jnp.sum(e, axis=-1, keepdims=True), approx=True)

    # Single lane-dense store: row 0 = last_h (padded), row 1 = probs (padded).
    out_ref[...] = jnp.concatenate([last_h, probs], axis=0)


@jax.jit
def _run_fused(x_leaf, op_feat, x_ax, f_reduce, others, *weights):
    args = (x_leaf, op_feat, x_ax, f_reduce, others, *weights)
    return pl.pallas_call(
        agent_fused_kernel,
        out_shape=jax.ShapeDtypeStruct((2, OUT_PAD), jnp.float32),
        in_specs=[_vmem()] * len(args),
        out_specs=_vmem(),
    )(*args)


def agent_forward_split(parent_feat, child_feat, op_feat, f_spatial, f_reduce,
                        f_up, others, packed_weights, n_out):
    """Fused forward for the demo graph, issue='split'. Returns (last_h, probs)."""
    x_leaf = jnp.concatenate([parent_feat, child_feat], axis=0)   # (2, NODE_FEAT)
    x_ax = jnp.concatenate([f_spatial, f_up], axis=0)             # (2, AXIS_FEAT)
    out = _run_fused(x_leaf, op_feat, x_ax, f_reduce, others, *packed_weights)
    return out[0:1, :HIDDEN], out[1:2, :n_out]


# ----------------------------------------------------------------------------
# Host-side one-time weight packing
# ----------------------------------------------------------------------------
def _pack_cell(Wr, br, Wz, bz, Wt, bt, feat):
    wx = jnp.concatenate([Wr[:feat], Wz[:feat], Wt[:feat]], axis=1)   # (F, 3H)
    wh = jnp.concatenate([Wr[feat:], Wz[feat:]], axis=1)              # (H, 2H)
    wth = Wt[feat:]                                                   # (H, H)
    b = jnp.concatenate([br, bz, bt], axis=1)                         # (1, 3H)
    return wx, wh, wth, b


def pack_axis_params(params, feat):
    W1, b1, Wt, bt = params
    return _pack_cell(W1[:, :HIDDEN], b1[:, :HIDDEN],
                      W1[:, HIDDEN:], b1[:, HIDDEN:], Wt, bt, feat)


def pack_node_params(params, feat):
    W, bW, U, bU, T, bT = params
    return _pack_cell(W, bW, U, bU, T, bT, feat)


def pack_head_params(trans_p, dec_p):
    Wt, bt = trans_p                       # (2H, H), (1, H)
    Wd, bd = dec_p                         # (H + AF, n_out), (1, n_out)
    n_out = Wd.shape[-1]
    f_other = Wd.shape[0] - HIDDEN
    wt_u = jnp.zeros((HIDDEN, OUT_PAD), jnp.float32).at[:, :HIDDEN].set(Wt[:HIDDEN])
    wt_d = jnp.zeros((HIDDEN, OUT_PAD), jnp.float32).at[:, :HIDDEN].set(Wt[HIDDEN:])
    bt_p = jnp.zeros((1, OUT_PAD), jnp.float32).at[:, :HIDDEN].set(bt)
    wd_h = jnp.zeros((OUT_PAD, OUT_PAD), jnp.float32).at[:HIDDEN, :n_out].set(Wd[:HIDDEN])
    wd_o = jnp.zeros((f_other, OUT_PAD), jnp.float32).at[:, :n_out].set(Wd[HIDDEN:])
    bd_p = jnp.full((1, OUT_PAD), NEG_BIG, jnp.float32).at[:, :n_out].set(bd)
    return wt_u, wt_d, bt_p, wd_h, wd_o, bd_p


# ----------------------------------------------------------------------------
# Pure-JAX references (mirror the PyTorch math with explicit concat)
# ----------------------------------------------------------------------------
def ref_axis_cell(x, h, params):
    W1, b1, Wt, bt = params
    act = jax.nn.sigmoid(jnp.concatenate([x, h], -1) @ W1 + b1)
    r, z = act[:, :HIDDEN], act[:, HIDDEN:]
    trans = jnp.tanh(jnp.concatenate([x, r * h], -1) @ Wt + bt)
    return (1.0 - z) * h + z * trans


def ref_node_cell(x, ch, params):
    W, bW, U, bU, T, bT = params
    num = ch.shape[0]
    h = jnp.sum(ch, axis=0, keepdims=True) / num
    xh = jnp.concatenate([x, h], -1)
    r = jax.nn.sigmoid(xh @ W + bW)
    z = jax.nn.sigmoid(xh @ U + bU)
    xb = jnp.broadcast_to(x, (num, x.shape[-1]))
    trans = jnp.tanh(jnp.concatenate([xb, r * ch], -1) @ T + bT)
    return jnp.sum((1.0 - z) * ch + z * trans, axis=0, keepdims=True) / num


def ref_head(up, down, others, trans_params, dec_params):
    Wt, bt = trans_params
    Wd, bd = dec_params
    last_h = jax.nn.relu(jnp.concatenate([up, down], -1) @ Wt + bt)
    logits = jnp.concatenate([last_h, others], -1) @ Wd + bd
    return last_h, jax.nn.softmax(logits, axis=-1)


# ----------------------------------------------------------------------------
# Deterministic parameter init (PyTorch-Linear-style uniform bounds)
# ----------------------------------------------------------------------------
def linear_params(key, din, dout):
    kw, kb = jax.random.split(key)
    bound = 1.0 / float(np.sqrt(din))
    w = jax.random.uniform(kw, (din, dout), jnp.float32, -bound, bound)
    b = jax.random.uniform(kb, (1, dout), jnp.float32, -bound, bound)
    return w, b


def make_axis_cell_params(key, feat):
    k1, k2 = jax.random.split(key)
    W1, b1 = linear_params(k1, feat + HIDDEN, 2 * HIDDEN)
    Wt, bt = linear_params(k2, feat + HIDDEN, HIDDEN)
    return (W1, b1, Wt, bt)


def make_node_cell_params(key, feat):
    k1, k2, k3 = jax.random.split(key, 3)
    W, bW = linear_params(k1, feat + HIDDEN, HIDDEN)
    U, bU = linear_params(k2, feat + HIDDEN, HIDDEN)
    T, bT = linear_params(k3, feat + HIDDEN, HIDDEN)
    return (W, bW, U, bU, T, bT)


if __name__ == "__main__":
    key = jax.random.PRNGKey(0)
    keys = jax.random.split(key, 12)

    node_p = make_node_cell_params(keys[0], NODE_FEAT)
    axis_p = make_axis_cell_params(keys[1], AXIS_FEAT)
    reduce_axis_p = make_axis_cell_params(keys[2], AXIS_FEAT)
    trans_p = linear_params(keys[3], 2 * HIDDEN, HIDDEN)                # _trans
    split_p = linear_params(keys[4], HIDDEN + AXIS_FEAT, SPLIT_PARTS)   # _split_decider

    # synthetic "graph" features (one parent op, one child op, the target op)
    parent_feat = jax.random.normal(keys[5], (1, NODE_FEAT), jnp.float32)
    child_feat = jax.random.normal(keys[6], (1, NODE_FEAT), jnp.float32)
    op_feat = jax.random.normal(keys[7], (1, NODE_FEAT), jnp.float32)
    f_spatial = jax.random.normal(keys[8], (1, AXIS_FEAT), jnp.float32)
    f_reduce = jax.random.normal(keys[9], (1, AXIS_FEAT), jnp.float32)
    f_up = jax.random.normal(keys[10], (1, AXIS_FEAT), jnp.float32)
    others = jax.random.normal(keys[11], (1, AXIS_FEAT), jnp.float32)   # issue='split'

    # One-time weight packing (done at "model build" time, not per call).
    packed_weights = (pack_node_params(node_p, NODE_FEAT)
                      + pack_axis_params(axis_p, AXIS_FEAT)
                      + pack_axis_params(reduce_axis_p, AXIS_FEAT)
                      + pack_head_params(trans_p, split_p))

    # ---- Pallas path: single fused kernel for the whole forward ------------
    last_h, probs = agent_forward_split(parent_feat, child_feat, op_feat,
                                        f_spatial, f_reduce, f_up, others,
                                        packed_weights, SPLIT_PARTS)
    jax.block_until_ready((last_h, probs))

    # ---- pure-JAX reference -------------------------------------------------
    zeros_h = jnp.zeros((1, HIDDEN), jnp.float32)
    r_down_parent = ref_node_cell(parent_feat, zeros_h, node_p)
    r_a_sp = ref_axis_cell(f_spatial, r_down_parent, axis_p)
    r_a_rd = ref_axis_cell(f_reduce, r_down_parent, reduce_axis_p)
    r_down_op = ref_node_cell(op_feat, jnp.concatenate([r_a_sp, r_a_rd], 0), node_p)
    r_up_child = ref_node_cell(child_feat, zeros_h, node_p)
    r_a_up = ref_axis_cell(f_up, r_up_child, axis_p)
    r_up_op = ref_node_cell(op_feat, r_a_up, node_p)
    r_last_h, r_probs = ref_head(r_up_op, r_down_op, others, trans_p, split_p)

    np.testing.assert_allclose(np.asarray(last_h), np.asarray(r_last_h),
                               rtol=1e-4, atol=1e-4)
    # approx reciprocal in the softmax denominator -> slightly looser tolerance
    np.testing.assert_allclose(np.asarray(probs), np.asarray(r_probs),
                               rtol=2e-3, atol=2e-3)
    assert abs(float(jnp.sum(probs)) - 1.0) < 5e-3

    # TODO(synk): the recursive dict-memoized graph traversal
    # (_get_down/up_graph_feature) and the string `issue` dispatch stay as
    # host-side Python; a fused kernel like this one is emitted per graph
    # topology. On v7x the independent down-/up-sweeps could further be split
    # across the two TensorCores (core_map) — not done here.
    print("KERNEL_OK")
</pallas_src>

<mosaic_0001>
module attributes {stable_mosaic.version = 11 : i64} {
  func.func @agent_fused_kernel(%arg0: memref<2x16xf32, #tpu.memory_space<vmem>>, %arg1: memref<1x16xf32, #tpu.memory_space<vmem>>, %arg2: memref<2x8xf32, #tpu.memory_space<vmem>>, %arg3: memref<1x8xf32, #tpu.memory_space<vmem>>, %arg4: memref<1x8xf32, #tpu.memory_space<vmem>>, %arg5: memref<16x96xf32, #tpu.memory_space<vmem>>, %arg6: memref<32x64xf32, #tpu.memory_space<vmem>>, %arg7: memref<32x32xf32, #tpu.memory_space<vmem>>, %arg8: memref<1x96xf32, #tpu.memory_space<vmem>>, %arg9: memref<8x96xf32, #tpu.memory_space<vmem>>, %arg10: memref<32x64xf32, #tpu.memory_space<vmem>>, %arg11: memref<32x32xf32, #tpu.memory_space<vmem>>, %arg12: memref<1x96xf32, #tpu.memory_space<vmem>>, %arg13: memref<8x96xf32, #tpu.memory_space<vmem>>, %arg14: memref<32x64xf32, #tpu.memory_space<vmem>>, %arg15: memref<32x32xf32, #tpu.memory_space<vmem>>, %arg16: memref<1x96xf32, #tpu.memory_space<vmem>>, %arg17: memref<32x128xf32, #tpu.memory_space<vmem>>, %arg18: memref<32x128xf32, #tpu.memory_space<vmem>>, %arg19: memref<1x128xf32, #tpu.memory_space<vmem>>, %arg20: memref<128x128xf32, #tpu.memory_space<vmem>>, %arg21: memref<8x128xf32, #tpu.memory_space<vmem>>, %arg22: memref<1x128xf32, #tpu.memory_space<vmem>>, %arg23: memref<2x128xf32, #tpu.memory_space<vmem>>) attributes {dimension_semantics = [], scalar_prefetch = 0 : i64, scratch_operands = 0 : i64, tpu.core_type = #tpu.core_type<tc>} {
    %c0 = arith.constant 0 : index
    %c0_0 = arith.constant 0 : index
    %0 = vector.load %arg5[%c0, %c0_0] : memref<16x96xf32, #tpu.memory_space<vmem>>, vector<16x96xf32>
    %c0_1 = arith.constant 0 : index
    %c0_2 = arith.constant 0 : index
    %1 = vector.load %arg6[%c0_1, %c0_2] : memref<32x64xf32, #tpu.memory_space<vmem>>, vector<32x64xf32>
    %c0_3 = arith.constant 0 : index
    %c0_4 = arith.constant 0 : index
    %2 = vector.load %arg7[%c0_3, %c0_4] : memref<32x32xf32, #tpu.memory_space<vmem>>, vector<32x32xf32>
    %c0_5 = arith.constant 0 : index
    %c0_6 = arith.constant 0 : index
    %3 = vector.load %arg8[%c0_5, %c0_6] : memref<1x96xf32, #tpu.memory_space<vmem>>, vector<1x96xf32>
    %c0_7 = arith.constant 0 : index
    %c0_8 = arith.constant 0 : index
    %4 = vector.load %arg9[%c0_7, %c0_8] : memref<8x96xf32, #tpu.memory_space<vmem>>, vector<8x96xf32>
    %c0_9 = arith.constant 0 : index
    %c0_10 = arith.constant 0 : index
    %5 = vector.load %arg10[%c0_9, %c0_10] : memref<32x64xf32, #tpu.memory_space<vmem>>, vector<32x64xf32>
    %c0_11 = arith.constant 0 : index
    %c0_12 = arith.constant 0 : index
    %6 = vector.load %arg11[%c0_11, %c0_12] : memref<32x32xf32, #tpu.memory_space<vmem>>, vector<32x32xf32>
    %c0_13 = arith.constant 0 : index
    %c0_14 = arith.constant 0 : index
    %7 = vector.load %arg12[%c0_13, %c0_14] : memref<1x96xf32, #tpu.memory_space<vmem>>, vector<1x96xf32>
    %c0_15 = arith.constant 0 : index
    %c0_16 = arith.constant 0 : index
    %8 = vector.load %arg13[%c0_15, %c0_16] : memref<8x96xf32, #tpu.memory_space<vmem>>, vector<8x96xf32>
    %c0_17 = arith.constant 0 : index
    %c0_18 = arith.constant 0 : index
    %9 = vector.load %arg14[%c0_17, %c0_18] : memref<32x64xf32, #tpu.memory_space<vmem>>, vector<32x64xf32>
    %c0_19 = arith.constant 0 : index
    %c0_20 = arith.constant 0 : index
    %10 = vector.load %arg15[%c0_19, %c0_20] : memref<32x32xf32, #tpu.memory_space<vmem>>, vector<32x32xf32>
    %c0_21 = arith.constant 0 : index
    %c0_22 = arith.constant 0 : index
    %11 = vector.load %arg16[%c0_21, %c0_22] : memref<1x96xf32, #tpu.memory_space<vmem>>, vector<1x96xf32>
    %cst = arith.constant 0.000000e+00 : f32
    %12 = vector.broadcast %cst : f32 to vector<2x32xf32>
    %c0_23 = arith.constant 0 : index
    %c0_24 = arith.constant 0 : index
    %13 = vector.load %arg0[%c0_23, %c0_24] : memref<2x16xf32, #tpu.memory_space<vmem>>, vector<2x16xf32>
    %cst_25 = arith.constant dense<0.000000e+00> : vector<2x96xf32>
    %14 = tpu.matmul %13, %0, %cst_25 {dimension_numbers = #tpu.dot_dimension_numbers<[1], [0], [0], [1], [0, 0, 1, 1], [], []>} : vector<2x16xf32>, vector<16x96xf32>, vector<2x96xf32> -> vector<2x96xf32>
    %cst_26 = arith.constant dense<0.000000e+00> : vector<2x64xf32>
    %15 = tpu.matmul %12, %1, %cst_26 {dimension_numbers = #tpu.dot_dimension_numbers<[1], [0], [0], [1], [0, 0, 1, 1], [], []>} : vector<2x32xf32>, vector<32x64xf32>, vector<2x64xf32> -> vector<2x64xf32>
    %16 = vector.extract_strided_slice %14 {offsets = [0, 0], sizes = [2, 64], strides = [1, 1]} : vector<2x96xf32> to vector<2x64xf32>
    %17 = arith.addf %16, %15 : vector<2x64xf32>
    %18 = vector.extract_strided_slice %3 {offsets = [0, 0], sizes = [1, 64], strides = [1, 1]} : vector<1x96xf32> to vector<1x64xf32>
    %19 = vector.broadcast %18 : vector<1x64xf32> to vector<2x64xf32>
    %20 = arith.addf %17, %19 : vector<2x64xf32>
    %21 = arith.negf %20 : vector<2x64xf32>
    %22 = math.exp %21 : vector<2x64xf32>
    %cst_27 = arith.constant 1.000000e+00 : f32
    %23 = vector.broadcast %cst_27 : f32 to vector<2x64xf32>
    %24 = arith.addf %23, %22 : vector<2x64xf32>
    %25 = arith.divf %23, %24 : vector<2x64xf32>
    %26 = vector.extract_strided_slice %25 {offsets = [0, 0], sizes = [2, 32], strides = [1, 1]} : vector<2x64xf32> to vector<2x32xf32>
    %27 = vector.extract_strided_slice %25 {offsets = [0, 32], sizes = [2, 32], strides = [1, 1]} : vector<2x64xf32> to vector<2x32xf32>
    %28 = vector.extract_strided_slice %14 {offsets = [0, 64], sizes = [2, 32], strides = [1, 1]} : vector<2x96xf32> to vector<2x32xf32>
    %29 = vector.extract_strided_slice %3 {offsets = [0, 64], sizes = [1, 32], strides = [1, 1]} : vector<1x96xf32> to vector<1x32xf32>
    %30 = vector.broadcast %29 : vector<1x32xf32> to vector<2x32xf32>
    %31 = arith.addf %28, %30 : vector<2x32xf32>
    %32 = arith.mulf %26, %12 : vector<2x32xf32>
    %cst_28 = arith.constant dense<0.000000e+00> : vector<2x32xf32>
    %33 = tpu.matmul %32, %2, %cst_28 {dimension_numbers = #tpu.dot_dimension_numbers<[1], [0], [0], [1], [0, 0, 1, 1], [], []>} : vector<2x32xf32>, vector<32x32xf32>, vector<2x32xf32> -> vector<2x32xf32>
    %34 = arith.addf %31, %33 : vector<2x32xf32>
    %35 = math.tanh %34 : vector<2x32xf32>
    %cst_29 = arith.constant 1.000000e+00 : f32
    %36 = vector.broadcast %cst_29 : f32 to vector<2x32xf32>
    %37 = arith.subf %36, %27 : vector<2x32xf32>
    %38 = arith.mulf %37, %12 : vector<2x32xf32>
    %39 = arith.mulf %27, %35 : vector<2x32xf32>
    %40 = arith.addf %38, %39 : vector<2x32xf32>
    %c0_30 = arith.constant 0 : index
    %c0_31 = arith.constant 0 : index
    %41 = vector.load %arg2[%c0_30, %c0_31] : memref<2x8xf32, #tpu.memory_space<vmem>>, vector<2x8xf32>
    %cst_32 = arith.constant dense<0.000000e+00> : vector<2x96xf32>
    %42 = tpu.matmul %41, %4, %cst_32 {dimension_numbers = #tpu.dot_dimension_numbers<[1], [0], [0], [1], [0, 0, 1, 1], [], []>} : vector<2x8xf32>, vector<8x96xf32>, vector<2x96xf32> -> vector<2x96xf32>
    %cst_33 = arith.constant dense<0.000000e+00> : vector<2x64xf32>
    %43 = tpu.matmul %40, %5, %cst_33 {dimension_numbers = #tpu.dot_dimension_numbers<[1], [0], [0], [1], [0, 0, 1, 1], [], []>} : vector<2x32xf32>, vector<32x64xf32>, vector<2x64xf32> -> vector<2x64xf32>
    %44 = vector.extract_strided_slice %42 {offsets = [0, 0], sizes = [2, 64], strides = [1, 1]} : vector<2x96xf32> to vector<2x64xf32>
    %45 = arith.addf %44, %43 : vector<2x64xf32>
    %46 = vector.extract_strided_slice %7 {offsets = [0, 0], sizes = [1, 64], strides = [1, 1]} : vector<1x96xf32> to vector<1x64xf32>
    %47 = vector.broadcast %46 : vector<1x64xf32> to vector<2x64xf32>
    %48 = arith.addf %45, %47 : vector<2x64xf32>
    %49 = arith.negf %48 : vector<2x64xf32>
    %50 = math.exp %49 : vector<2x64xf32>
    %cst_34 = arith.constant 1.000000e+00 : f32
    %51 = vector.broadcast %cst_34 : f32 to vector<2x64xf32>
    %52 = arith.addf %51, %50 : vector<2x64xf32>
    %53 = arith.divf %51, %52 : vector<2x64xf32>
    %54 = vector.extract_strided_slice %53 {offsets = [0, 0], sizes = [2, 32], strides = [1, 1]} : vector<2x64xf32> to vector<2x32xf32>
    %55 = vector.extract_strided_slice %53 {offsets = [0, 32], sizes = [2, 32], strides = [1, 1]} : vector<2x64xf32> to vector<2x32xf32>
    %56 = vector.extract_strided_slice %42 {offsets = [0, 64], sizes = [2, 32], strides = [1, 1]} : vector<2x96xf32> to vector<2x32xf32>
    %57 = vector.extract_strided_slice %7 {offsets = [0, 64], sizes = [1, 32], strides = [1, 1]} : vector<1x96xf32> to vector<1x32xf32>
    %58 = vector.broadcast %57 : vector<1x32xf32> to vector<2x32xf32>
    %59 = arith.addf %56, %58 : vector<2x32xf32>
    %60 = arith.mulf %54, %40 : vector<2x32xf32>
    %cst_35 = arith.constant dense<0.000000e+00> : vector<2x32xf32>
    %61 = tpu.matmul %60, %6, %cst_35 {dimension_numbers = #tpu.dot_dimension_numbers<[1], [0], [0], [1], [0, 0, 1, 1], [], []>} : vector<2x32xf32>, vector<32x32xf32>, vector<2x32xf32> -> vector<2x32xf32>
    %62 = arith.addf %59, %61 : vector<2x32xf32>
    %63 = math.tanh %62 : vector<2x32xf32>
    %cst_36 = arith.constant 1.000000e+00 : f32
    %64 = vector.broadcast %cst_36 : f32 to vector<2x32xf32>
    %65 = arith.subf %64, %55 : vector<2x32xf32>
    %66 = arith.mulf %65, %40 : vector<2x32xf32>
    %67 = arith.mulf %55, %63 : vector<2x32xf32>
    %68 = arith.addf %66, %67 : vector<2x32xf32>
    %c0_37 = arith.constant 0 : index
    %c0_38 = arith.constant 0 : index
    %69 = vector.load %arg3[%c0_37, %c0_38] : memref<1x8xf32, #tpu.memory_space<vmem>>, vector<1x8xf32>
    %70 = vector.extract_strided_slice %40 {offsets = [0, 0], sizes = [1, 32], strides = [1, 1]} : vector<2x32xf32> to vector<1x32xf32>
    %cst_39 = arith.constant dense<0.000000e+00> : vector<1x96xf32>
    %71 = tpu.matmul %69, %8, %cst_39 {dimension_numbers = #tpu.dot_dimension_numbers<[1], [0], [0], [1], [0, 0, 1, 1], [], []>} : vector<1x8xf32>, vector<8x96xf32>, vector<1x96xf32> -> vector<1x96xf32>
    %cst_40 = arith.constant dense<0.000000e+00> : vector<1x64xf32>
    %72 = tpu.matmul %70, %9, %cst_40 {dimension_numbers = #tpu.dot_dimension_numbers<[1], [0], [0], [1], [0, 0, 1, 1], [], []>} : vector<1x32xf32>, vector<32x64xf32>, vector<1x64xf32> -> vector<1x64xf32>
    %73 = vector.extract_strided_slice %71 {offsets = [0, 0], sizes = [1, 64], strides = [1, 1]} : vector<1x96xf32> to vector<1x64xf32>
    %74 = arith.addf %73, %72 : vector<1x64xf32>
    %75 = vector.extract_strided_slice %11 {offsets = [0, 0], sizes = [1, 64], strides = [1, 1]} : vector<1x96xf32> to vector<1x64xf32>
    %76 = arith.addf %74, %75 : vector<1x64xf32>
    %77 = arith.negf %76 : vector<1x64xf32>
    %78 = math.exp %77 : vector<1x64xf32>
    %cst_41 = arith.constant 1.000000e+00 : f32
    %79 = vector.broadcast %cst_41 : f32 to vector<1x64xf32>
    %80 = arith.addf %79, %78 : vector<1x64xf32>
    %81 = arith.divf %79, %80 : vector<1x64xf32>
    %82 = vector.extract_strided_slice %81 {offsets = [0, 0], sizes = [1, 32], strides = [1, 1]} : vector<1x64xf32> to vector<1x32xf32>
    %83 = vector.extract_strided_slice %81 {offsets = [0, 32], sizes = [1, 32], strides = [1, 1]} : vector<1x64xf32> to vector<1x32xf32>
    %84 = vector.extract_strided_slice %71 {offsets = [0, 64], sizes = [1, 32], strides = [1, 1]} : vector<1x96xf32> to vector<1x32xf32>
    %85 = vector.extract_strided_slice %11 {offsets = [0, 64], sizes = [1, 32], strides = [1, 1]} : vector<1x96xf32> to vector<1x32xf32>
    %86 = arith.addf %84, %85 : vector<1x32xf32>
    %87 = arith.mulf %82, %70 : vector<1x32xf32>
    %cst_42 = arith.constant dense<0.000000e+00> : vector<1x32xf32>
    %88 = tpu.matmul %87, %10, %cst_42 {dimension_numbers = #tpu.dot_dimension_numbers<[1], [0], [0], [1], [0, 0, 1, 1], [], []>} : vector<1x32xf32>, vector<32x32xf32>, vector<1x32xf32> -> vector<1x32xf32>
    %89 = arith.addf %86, %88 : vector<1x32xf32>
    %90 = math.tanh %89 : vector<1x32xf32>
    %cst_43 = arith.constant 1.000000e+00 : f32
    %91 = vector.broadcast %cst_43 : f32 to vector<1x32xf32>
    %92 = arith.subf %91, %83 : vector<1x32xf32>
    %93 = arith.mulf %92, %70 : vector<1x32xf32>
    %94 = arith.mulf %83, %90 : vector<1x32xf32>
    %95 = arith.addf %93, %94 : vector<1x32xf32>
    %c0_44 = arith.constant 0 : index
    %c0_45 = arith.constant 0 : index
    %96 = vector.load %arg1[%c0_44, %c0_45] : memref<1x16xf32, #tpu.memory_space<vmem>>, vector<1x16xf32>
    %97 = vector.extract_strided_slice %68 {offsets = [0, 0], sizes = [1, 32], strides = [1, 1]} : vector<2x32xf32> to vector<1x32xf32>
    %98 = tpu.concatenate %97, %95 in 0 : vector<1x32xf32>, vector<1x32xf32> -> vector<2x32xf32>
    %cst_46 = arith.constant dense<0.000000e+00> : vector<32xf32>
    %99 = vector.multi_reduction <add>, %98, %cst_46 [0] : vector<2x32xf32> to vector<32xf32>
    %100 = vector.shape_cast %99 : vector<32xf32> to vector<1x32xf32>
    %cst_47 = arith.constant 5.000000e-01 : f32
    %101 = vector.broadcast %cst_47 : f32 to vector<1x32xf32>
    %102 = arith.mulf %100, %101 : vector<1x32xf32>
    %cst_48 = arith.constant dense<0.000000e+00> : vector<1x96xf32>
    %103 = tpu.matmul %96, %0, %cst_48 {dimension_numbers = #tpu.dot_dimension_numbers<[1], [0], [0], [1], [0, 0, 1, 1], [], []>} : vector<1x16xf32>, vector<16x96xf32>, vector<1x96xf32> -> vector<1x96xf32>
    %cst_49 = arith.constant dense<0.000000e+00> : vector<1x64xf32>
    %104 = tpu.matmul %102, %1, %cst_49 {dimension_numbers = #tpu.dot_dimension_numbers<[1], [0], [0], [1], [0, 0, 1, 1], [], []>} : vector<1x32xf32>, vector<32x64xf32>, vector<1x64xf32> -> vector<1x64xf32>
    %105 = vector.extract_strided_slice %103 {offsets = [0, 0], sizes = [1, 64], strides = [1, 1]} : vector<1x96xf32> to vector<1x64xf32>
    %106 = arith.addf %105, %104 : vector<1x64xf32>
    %107 = vector.extract_strided_slice %3 {offsets = [0, 0], sizes = [1, 64], strides = [1, 1]} : vector<1x96xf32> to vector<1x64xf32>
    %108 = arith.addf %106, %107 : vector<1x64xf32>
    %109 = arith.negf %108 : vector<1x64xf32>
    %110 = math.exp %109 : vector<1x64xf32>
    %cst_50 = arith.constant 1.000000e+00 : f32
    %111 = vector.broadcast %cst_50 : f32 to vector<1x64xf32>
    %112 = arith.addf %111, %110 : vector<1x64xf32>
    %113 = arith.divf %111, %112 : vector<1x64xf32>
    %114 = vector.extract_strided_slice %113 {offsets = [0, 0], sizes = [1, 32], strides = [1, 1]} : vector<1x64xf32> to vector<1x32xf32>
    %115 = vector.extract_strided_slice %113 {offsets = [0, 32], sizes = [1, 32], strides = [1, 1]} : vector<1x64xf32> to vector<1x32xf32>
    %116 = vector.extract_strided_slice %103 {offsets = [0, 64], sizes = [1, 32], strides = [1, 1]} : vector<1x96xf32> to vector<1x32xf32>
    %117 = vector.extract_strided_slice %3 {offsets = [0, 64], sizes = [1, 32], strides = [1, 1]} : vector<1x96xf32> to vector<1x32xf32>
    %118 = arith.addf %116, %117 : vector<1x32xf32>
    %119 = vector.broadcast %114 : vector<1x32xf32> to vector<2x32xf32>
    %120 = arith.mulf %119, %98 : vector<2x32xf32>
    %cst_51 = arith.constant dense<0.000000e+00> : vector<2x32xf32>
    %121 = tpu.matmul %120, %2, %cst_51 {dimension_numbers = #tpu.dot_dimension_numbers<[1], [0], [0], [1], [0, 0, 1, 1], [], []>} : vector<2x32xf32>, vector<32x32xf32>, vector<2x32xf32> -> vector<2x32xf32>
    %122 = vector.broadcast %118 : vector<1x32xf32> to vector<2x32xf32>
    %123 = arith.addf %122, %121 : vector<2x32xf32>
    %124 = math.tanh %123 : vector<2x32xf32>
    %cst_52 = arith.constant 1.000000e+00 : f32
    %125 = vector.broadcast %cst_52 : f32 to vector<1x32xf32>
    %126 = arith.subf %125, %115 : vector<1x32xf32>
    %127 = vector.broadcast %126 : vector<1x32xf32> to vector<2x32xf32>
    %128 = arith.mulf %127, %98 : vector<2x32xf32>
    %129 = vector.broadcast %115 : vector<1x32xf32> to vector<2x32xf32>
    %130 = arith.mulf %129, %124 : vector<2x32xf32>
    %131 = arith.addf %128, %130 : vector<2x32xf32>
    %cst_53 = arith.constant dense<0.000000e+00> : vector<32xf32>
    %132 = vector.multi_reduction <add>, %131, %cst_53 [0] : vector<2x32xf32> to vector<32xf32>
    %133 = vector.shape_cast %132 : vector<32xf32> to vector<1x32xf32>
    %cst_54 = arith.constant 5.000000e-01 : f32
    %134 = vector.broadcast %cst_54 : f32 to vector<1x32xf32>
    %135 = arith.mulf %133, %134 : vector<1x32xf32>
    %136 = vector.extract_strided_slice %68 {offsets = [1, 0], sizes = [1, 32], strides = [1, 1]} : vector<2x32xf32> to vector<1x32xf32>
    %cst_55 = arith.constant dense<0.000000e+00> : vector<1x96xf32>
    %137 = tpu.matmul %96, %0, %cst_55 {dimension_numbers = #tpu.dot_dimension_numbers<[1], [0], [0], [1], [0, 0, 1, 1], [], []>} : vector<1x16xf32>, vector<16x96xf32>, vector<1x96xf32> -> vector<1x96xf32>
    %cst_56 = arith.constant dense<0.000000e+00> : vector<1x64xf32>
    %138 = tpu.matmul %136, %1, %cst_56 {dimension_numbers = #tpu.dot_dimension_numbers<[1], [0], [0], [1], [0, 0, 1, 1], [], []>} : vector<1x32xf32>, vector<32x64xf32>, vector<1x64xf32> -> vector<1x64xf32>
    %139 = vector.extract_strided_slice %137 {offsets = [0, 0], sizes = [1, 64], strides = [1, 1]} : vector<1x96xf32> to vector<1x64xf32>
    %140 = arith.addf %139, %138 : vector<1x64xf32>
    %141 = vector.extract_strided_slice %3 {offsets = [0, 0], sizes = [1, 64], strides = [1, 1]} : vector<1x96xf32> to vector<1x64xf32>
    %142 = arith.addf %140, %141 : vector<1x64xf32>
    %143 = arith.negf %142 : vector<1x64xf32>
    %144 = math.exp %143 : vector<1x64xf32>
    %cst_57 = arith.constant 1.000000e+00 : f32
    %145 = vector.broadcast %cst_57 : f32 to vector<1x64xf32>
    %146 = arith.addf %145, %144 : vector<1x64xf32>
    %147 = arith.divf %145, %146 : vector<1x64xf32>
    %148 = vector.extract_strided_slice %147 {offsets = [0, 0], sizes = [1, 32], strides = [1, 1]} : vector<1x64xf32> to vector<1x32xf32>
    %149 = vector.extract_strided_slice %147 {offsets = [0, 32], sizes = [1, 32], strides = [1, 1]} : vector<1x64xf32> to vector<1x32xf32>
    %150 = vector.extract_strided_slice %137 {offsets = [0, 64], sizes = [1, 32], strides = [1, 1]} : vector<1x96xf32> to vector<1x32xf32>
    %151 = vector.extract_strided_slice %3 {offsets = [0, 64], sizes = [1, 32], strides = [1, 1]} : vector<1x96xf32> to vector<1x32xf32>
    %152 = arith.addf %150, %151 : vector<1x32xf32>
    %153 = arith.mulf %148, %136 : vector<1x32xf32>
    %cst_58 = arith.constant dense<0.000000e+00> : vector<1x32xf32>
    %154 = tpu.matmul %153, %2, %cst_58 {dimension_numbers = #tpu.dot_dimension_numbers<[1], [0], [0], [1], [0, 0, 1, 1], [], []>} : vector<1x32xf32>, vector<32x32xf32>, vector<1x32xf32> -> vector<1x32xf32>
    %155 = arith.addf %152, %154 : vector<1x32xf32>
    %156 = math.tanh %155 : vector<1x32xf32>
    %cst_59 = arith.constant 1.000000e+00 : f32
    %157 = vector.broadcast %cst_59 : f32 to vector<1x32xf32>
    %158 = arith.subf %157, %149 : vector<1x32xf32>
    %159 = arith.mulf %158, %136 : vector<1x32xf32>
    %160 = arith.mulf %149, %156 : vector<1x32xf32>
    %161 = arith.addf %159, %160 : vector<1x32xf32>
    %c0_60 = arith.constant 0 : index
    %c0_61 = arith.constant 0 : index
    %162 = vector.load %arg17[%c0_60, %c0_61] : memref<32x128xf32, #tpu.memory_space<vmem>>, vector<32x128xf32>
    %cst_62 = arith.constant dense<0.000000e+00> : vector<1x128xf32>
    %163 = tpu.matmul %161, %162, %cst_62 {dimension_numbers = #tpu.dot_dimension_numbers<[1], [0], [0], [1], [0, 0, 1, 1], [], []>} : vector<1x32xf32>, vector<32x128xf32>, vector<1x128xf32> -> vector<1x128xf32>
    %c0_63 = arith.constant 0 : index
    %c0_64 = arith.constant 0 : index
    %164 = vector.load %arg18[%c0_63, %c0_64] : memref<32x128xf32, #tpu.memory_space<vmem>>, vector<32x128xf32>
    %cst_65 = arith.constant dense<0.000000e+00> : vector<1x128xf32>
    %165 = tpu.matmul %135, %164, %cst_65 {dimension_numbers = #tpu.dot_dimension_numbers<[1], [0], [0], [1], [0, 0, 1, 1], [], []>} : vector<1x32xf32>, vector<32x128xf32>, vector<1x128xf32> -> vector<1x128xf32>
    %166 = arith.addf %163, %165 : vector<1x128xf32>
    %c0_66 = arith.constant 0 : index
    %c0_67 = arith.constant 0 : index
    %167 = vector.load %arg19[%c0_66, %c0_67] : memref<1x128xf32, #tpu.memory_space<vmem>>, vector<1x128xf32>
    %168 = arith.addf %166, %167 : vector<1x128xf32>
    %cst_68 = arith.constant 0.000000e+00 : f32
    %169 = vector.broadcast %cst_68 : f32 to vector<1x128xf32>
    %170 = arith.maximumf %168, %169 : vector<1x128xf32>
    %c0_69 = arith.constant 0 : index
    %c0_70 = arith.constant 0 : index
    %171 = vector.load %arg20[%c0_69, %c0_70] : memref<128x128xf32, #tpu.memory_space<vmem>>, vector<128x128xf32>
    %cst_71 = arith.constant dense<0.000000e+00> : vector<1x128xf32>
    %172 = tpu.matmul %170, %171, %cst_71 {dimension_numbers = #tpu.dot_dimension_numbers<[1], [0], [0], [1], [0, 0, 1, 1], [], []>} : vector<1x128xf32>, vector<128x128xf32>, vector<1x128xf32> -> vector<1x128xf32>
    %c0_72 = arith.constant 0 : index
    %c0_73 = arith.constant 0 : index
    %173 = vector.load %arg4[%c0_72, %c0_73] : memref<1x8xf32, #tpu.memory_space<vmem>>, vector<1x8xf32>
    %c0_74 = arith.constant 0 : index
    %c0_75 = arith.constant 0 : index
    %174 = vector.load %arg21[%c0_74, %c0_75] : memref<8x128xf32, #tpu.memory_space<vmem>>, vector<8x128xf32>
    %cst_76 = arith.constant dense<0.000000e+00> : vector<1x128xf32>
    %175 = tpu.matmul %173, %174, %cst_76 {dimension_numbers = #tpu.dot_dimension_numbers<[1], [0], [0], [1], [0, 0, 1, 1], [], []>} : vector<1x8xf32>, vector<8x128xf32>, vector<1x128xf32> -> vector<1x128xf32>
    %176 = arith.addf %172, %175 : vector<1x128xf32>
    %c0_77 = arith.constant 0 : index
    %c0_78 = arith.constant 0 : index
    %177 = vector.load %arg22[%c0_77, %c0_78] : memref<1x128xf32, #tpu.memory_space<vmem>>, vector<1x128xf32>
    %178 = arith.addf %176, %177 : vector<1x128xf32>
    %cst_79 = arith.constant dense<0xFF800000> : vector<1xf32>
    %179 = vector.multi_reduction <maximumf>, %178, %cst_79 [1] : vector<1x128xf32> to vector<1xf32>
    %180 = vector.shape_cast %179 : vector<1xf32> to vector<1x1xf32>
    %181 = vector.broadcast %180 : vector<1x1xf32> to vector<1x128xf32>
    %182 = arith.subf %178, %181 : vector<1x128xf32>
    %183 = math.exp %182 : vector<1x128xf32>
    %cst_80 = arith.constant dense<0.000000e+00> : vector<1xf32>
    %184 = vector.multi_reduction <add>, %183, %cst_80 [1] : vector<1x128xf32> to vector<1xf32>
    %185 = vector.shape_cast %184 : vector<1xf32> to vector<1x1xf32>
    %186 = tpu.reciprocal %185 {approx = true} : vector<1x1xf32> -> vector<1x1xf32>
    %187 = vector.broadcast %186 : vector<1x1xf32> to vector<1x128xf32>
    %188 = arith.mulf %183, %187 : vector<1x128xf32>
    %189 = tpu.concatenate %170, %188 in 0 : vector<1x128xf32>, vector<1x128xf32> -> vector<2x128xf32>
    %c0_81 = arith.constant 0 : index
    %c0_82 = arith.constant 0 : index
    %190 = vector.load %arg23[%c0_81, %c0_82] : memref<2x128xf32, #tpu.memory_space<vmem>>, vector<2x128xf32>
    tpu.vector_store %arg23[%c0_81, %c0_82], %189 {strides = array<i32>} : memref<2x128xf32, #tpu.memory_space<vmem>>, vector<2x128xf32>,
    return
  }
}

</mosaic_0001>

<bundles_post_ra>
// kernel: _run_fused.1
= control target key start
LH: loop header
LB: loop body
LE: loop exit
PB: predicated region body
PF: predicated region fallthrough
CT: control target
= control target key end

     0   :  { %s2058_s0 = inlined_call_operand.hbm [shape: f32[2,16], index: 0, kind: input, shape index: {}]   ;;  %s2059_s1 = inlined_call_operand.hbm [shape: f32[1,16], index: 1, kind: input, shape index: {}]   ;;  %s2060_s2 = inlined_call_operand.hbm [shape: f32[2,8], index: 2, kind: input, shape index: {}]   ;;  %s2061_s3 = inlined_call_operand.hbm [shape: f32[1,8], index: 3, kind: input, shape index: {}]   ;;  %s2062_s4 = inlined_call_operand.hbm [shape: f32[1,8], index: 4, kind: input, shape index: {}]   ;;  %s2063_s5 = inlined_call_operand.hbm [shape: f32[16,96], index: 5, kind: input, shape index: {}]   ;;  %s2064_s6 = inlined_call_operand.hbm [shape: f32[32,64], index: 6, kind: input, shape index: {}]   ;;  %s2065_s7 = inlined_call_operand.hbm [shape: f32[32,32], index: 7, kind: input, shape index: {}]   ;;  %s2066_s8 = inlined_call_operand.hbm [shape: f32[1,96], index: 8, kind: input, shape index: {}]   ;;  %s2067_s9 = inlined_call_operand.vmem [shape: f32[8,96], index: 9, kind: input, shape index: {}]   ;;  %s2068_s10 = inlined_call_operand.hbm [shape: f32[32,64], index: 10, kind: input, shape index: {}]   ;;  %s2069_s11 = inlined_call_operand.hbm [shape: f32[32,32], index: 11, kind: input, shape index: {}]   ;;  %s2070_s12 = inlined_call_operand.hbm [shape: f32[1,96], index: 12, kind: input, shape index: {}]   ;;  %s2071_s13 = inlined_call_operand.hbm [shape: f32[8,96], index: 13, kind: input, shape index: {}]   ;;  %s2072_s14 = inlined_call_operand.hbm [shape: f32[32,64], index: 14, kind: input, shape index: {}]   ;;  %s2073_s15 = inlined_call_operand.hbm [shape: f32[32,32], index: 15, kind: input, shape index: {}]   ;;  %s2074_s16 = inlined_call_operand.hbm [shape: f32[1,96], index: 16, kind: input, shape index: {}]   ;;  %s2075_s17 = inlined_call_operand.hbm [shape: f32[32,128], index: 17, kind: input, shape index: {}]   ;;  %s2076_s18 = inlined_call_operand.hbm [shape: f32[32,128], index: 18, kind: input, shape index: {}]   ;;  %s2077_s19 = inlined_call_operand.vmem [shape: f32[1,128], index: 19, kind: input, shape index: {}]   ;;  %s2078_s20 = inlined_call_operand.hbm [shape: f32[128,128], index: 20, kind: input, shape index: {}]   ;;  %s2079_s21 = inlined_call_operand.vmem [shape: f32[8,128], index: 21, kind: input, shape index: {}]   ;;  %s2080_s22 = inlined_call_operand.vmem [shape: f32[1,128], index: 22, kind: input, shape index: {}]   ;;  %s2081_s23 = inlined_call_operand.hbm [shape: f32[2,128], index: 23, kind: output, shape index: {}]  }
   0x1   :  { %2082 = sst [smem:[#allocation44_spill]] %s2058_s0 }
   0x2   :  { %2083 = sst [smem:[#allocation45_spill]] %s2059_s1 }
   0x3   :  { %2084 = sst [smem:[#allocation46_spill]] %s2060_s2 }
   0x4   :  { %2085 = sst [smem:[#allocation47_spill]] %s2061_s3 }
   0x5   :  { %2086 = sst [smem:[#allocation48_spill]] %s2062_s4 }
   0x6   :  { %2087 = sst [smem:[#allocation49_spill]] %s2063_s5 }
   0x7   :  { %2088 = sst [smem:[#allocation50_spill]] %s2064_s6 }
   0x8   :  { %2089 = sst [smem:[#allocation51_spill]] %s2065_s7 }
   0x9   :  { %2090 = sst [smem:[#allocation52_spill]] %s2077_s19 }
   0xa   :  { %2091 = sst [smem:[#allocation53_spill]] %s2080_s22 }
   0xb   :  { %2092 = sst [smem:[#allocation54_spill]] %s2081_s23 }
   0xc   :  { %28 = vsyncpa [#allocation3], 0 }
   0xd   :  { %29 = vsyncpa [#allocation6], 0 }
   0xe   :  { %30 = vsyncpa [#allocation9], 0 }
   0xf   :  { %31 = vsyncpa [#allocation12], 0 }
  0x10   :  { %32 = vsyncpa [#allocation15], 0 }
  0x11   :  { %33 = vsyncpa [#allocation18], 0 }
  0x12   :  { %34 = vsyncpa [#allocation21], 0 }
  0x13   :  { %35 = vsyncpa [#allocation24], 0 }
  0x14   :  { %36 = vsyncpa [#allocation27], 0 }
  0x15   :  { %37 = vsyncpa [#allocation30], 0  ;;  %s2093_s24 = sld [smem:[#allocation45_spill]] }
  0x1b   :  { %s55_s25 = sshll.u32 %s2093_s24, 4  ;;  %s56_s25 = int_to_ptr.hbm [resolvable:$true] %s55_s25 }
  0x1c   :  { %38 = vsyncpa [#allocation4], 0  ;;  %s1688_s5 = smov [#allocation5]   ;;  %s2094_s6 = sld [smem:[#allocation47_spill]] }
  0x1d   :  { %s57_s1 = sshll.u32 %s1688_s5, 4  ;;  %s1689_s7 = smov [#allocation8]   ;;  %s58_s1 = int_to_ptr.vmem [resolvable:$true] %s57_s1 }
  0x1e   :  { %60 = dma.hbm_to_vmem [thread:$0]  %s56_s25, 16, %s58_s1, [#allocation6]  }
  0x1f   :  { %s79_s28 = sshll.u32 %s1689_s7, 4  ;;  %s2095_s0 = sld [smem:[#allocation49_spill]]  ;;  %s80_s28 = int_to_ptr.vmem [resolvable:$true] %s79_s28 }
  0x20   :  { %s1690_s4 = smov [#allocation11]   ;;  %s2096_s22 = sld [smem:[#allocation51_spill]] }
  0x21   :  { %s100_s30 = sshll.u32 %s1690_s4, 4  ;;  %s1691_s26 = smov 128   ;;  %s101_s30 = int_to_ptr.vmem [resolvable:$true] %s100_s30 }
  0x22   :  { %s77_s27 = sshll.u32 %s2094_s6, 4  ;;  %s1692_s2 = smov 8   ;;  %s78_s27 = int_to_ptr.hbm [resolvable:$true] %s77_s27 }
  0x23   :  { %82 = dma.hbm_to_vmem [thread:$0]  %s78_s27, 16, %s80_s28, [#allocation9]  }
  0x24   :  { %s1693_s25 = smov [#allocation14]   ;;  %s150_s27 = sshll.u32 %s2068_s10, 4  ;;  %s151_s27 = int_to_ptr.hbm [resolvable:$true] %s150_s27 }
  0x25   :  { %s98_s23 = sshll.u32 %s2095_s0, 4  ;;  %s126_s1 = sshll.u32 %s1693_s25, 4  ;;  %s99_s23 = int_to_ptr.hbm [resolvable:$true] %s98_s23  ;;  %s127_s1 = int_to_ptr.vmem [resolvable:$true] %s126_s1 }
  0x26   :  { %s124_s19 = sshll.u32 %s2096_s22, 4  ;;  %s177_s29 = sshll.u32 %s2070_s12, 4  ;;  %s125_s19 = int_to_ptr.hbm [resolvable:$true] %s124_s19  ;;  %s178_s29 = int_to_ptr.hbm [resolvable:$true] %s177_s29 }
  0x27   :  { %106 = dma.hbm_to_vmem [thread:$0]  %s99_s23, 256, %s101_s30, [#allocation12], %s1691_s26, %s1691_s26, %s1692_s2  }
  0x28   :  { %132 = dma.hbm_to_vmem [thread:$0]  %s125_s19, 512, %s127_s1, [#allocation15], %s1691_s26, %s1691_s26, %s1692_s2  }
  0x29   :  { %s1694_s3 = smov [#allocation17]   ;;  %s1695_s23 = smov [#allocation20]  }
  0x2a   :  { %s152_s0 = sshll.u32 %s1694_s3, 4  ;;  %s179_s10 = sshll.u32 %s1695_s23, 4  ;;  %s153_s0 = int_to_ptr.vmem [resolvable:$true] %s152_s0  ;;  %s180_s10 = int_to_ptr.vmem [resolvable:$true] %s179_s10 }
  0x2b   :  { %158 = dma.hbm_to_vmem [thread:$0]  %s151_s27, 512, %s153_s0, [#allocation18], %s1691_s26, %s1691_s26, %s1692_s2  }
  0x2c   :  { %s198_s24 = sshll.u32 %s2072_s14, 4  ;;  %s225_s12 = sshll.u32 %s2074_s16, 4  ;;  %s199_s24 = int_to_ptr.hbm [resolvable:$true] %s198_s24  ;;  %s226_s12 = int_to_ptr.hbm [resolvable:$true] %s225_s12 }
  0x2d   :  { %182 = dma.hbm_to_vmem [thread:$0]  %s178_s29, 16, %s180_s10, [#allocation21]  }
  0x2e   :  { %s1696_s25 = smov [#allocation23]   ;;  %s1697_s6 = smov [#allocation26]  }
  0x2f   :  { %s200_s1 = sshll.u32 %s1696_s25, 4  ;;  %s227_s7 = sshll.u32 %s1697_s6, 4  ;;  %s201_s1 = int_to_ptr.vmem [resolvable:$true] %s200_s1  ;;  %s228_s7 = int_to_ptr.vmem [resolvable:$true] %s227_s7 }
  0x30   :  { %206 = dma.hbm_to_vmem [thread:$0]  %s199_s24, 512, %s201_s1, [#allocation24], %s1691_s26, %s1691_s26, %s1692_s2  }
  0x31   :  { %s248_s14 = sshll.u32 %s2076_s18, 4  ;;  %s2097_s16 = sld [smem:[#allocation44_spill]]  ;;  %s249_s14 = int_to_ptr.hbm [resolvable:$true] %s248_s14 }
  0x32   :  { %230 = dma.hbm_to_vmem [thread:$0]  %s226_s12, 16, %s228_s7, [#allocation27]  }
  0x33   :  { %s1698_s0 = smov [#allocation29]   ;;  %s1699_s10 = smov [#allocation2]  }
  0x34   :  { %s250_s23 = sshll.u32 %s1698_s0, 4  ;;  %s46_s4 = sshll.u32 %s1699_s10, 4  ;;  %s251_s23 = int_to_ptr.vmem [resolvable:$true] %s250_s23  ;;  %s47_s4 = int_to_ptr.vmem [resolvable:$true] %s46_s4 }
  0x35   :  { %256 = dma.hbm_to_vmem [thread:$0]  %s249_s14, 512, %s251_s23, [#allocation30], %s1691_s26, %s1691_s26, %s1692_s2  }
  0x36   :  { %s2098_s18 = sld [smem:[#allocation46_spill]]  ;;  %s1700_s6 = smov [#allocation7]  }
  0x37   :  { %s44_s3 = sshll.u32 %s2097_s16, 4  ;;  %s2099_s25 = sld [smem:[#allocation48_spill]]  ;;  %s45_s3 = int_to_ptr.hbm [resolvable:$true] %s44_s3 }
  0x38   :  { %49 = dma.hbm_to_vmem [thread:$0]  %s45_s3, 32, %s47_s4, [#allocation3]  }
  0x39   :  { %s68_s7 = sshll.u32 %s1700_s6, 4  ;;  %s1701_s27 = smov [#allocation10]   ;;  %s69_s7 = int_to_ptr.vmem [resolvable:$true] %s68_s7 }
  0x3a   :  { %s90_s22 = sshll.u32 %s1701_s27, 4  ;;  %s2100_s29 = sld [smem:[#allocation50_spill]]  ;;  %s91_s22 = int_to_ptr.vmem [resolvable:$true] %s90_s22 }
  0x3b   :  { %s138_s23 = sshll.u32 %s2066_s8, 4  ;;  %s1702_s10 = smov [#allocation13]   ;;  %s139_s23 = int_to_ptr.hbm [resolvable:$true] %s138_s23 }
  0x3c   :  { %s66_s19 = sshll.u32 %s2098_s18, 4  ;;  %s113_s4 = sshll.u32 %s1702_s10, 4  ;;  %s67_s19 = int_to_ptr.hbm [resolvable:$true] %s66_s19  ;;  %s114_s4 = int_to_ptr.vmem [resolvable:$true] %s113_s4 }
  0x3d   :  { %s88_s1 = sshll.u32 %s2099_s25, 4  ;;  %s1703_s30 = smov [#allocation16]   ;;  %s89_s1 = int_to_ptr.hbm [resolvable:$true] %s88_s1 }
  0x3e   :  { %71 = dma.hbm_to_vmem [thread:$0]  %s67_s19, 32, %s69_s7, [#allocation6]  }
  0x3f   :  { %93 = dma.hbm_to_vmem [thread:$0]  %s89_s1, 16, %s91_s22, [#allocation9]  }
  0x40   :  { %s111_s16 = sshll.u32 %s2100_s29, 4  ;;  %s140_s24 = sshll.u32 %s1703_s30, 4  ;;  %s112_s16 = int_to_ptr.hbm [resolvable:$true] %s111_s16  ;;  %s141_s24 = int_to_ptr.vmem [resolvable:$true] %s140_s24 }
  0x41   :  { %119 = dma.hbm_to_vmem [thread:$0]  %s112_s16, 512, %s114_s4, [#allocation12], %s1691_s26, %s1691_s26, %s1692_s2  }
  0x42   :  { %s163_s5 = sshll.u32 %s2069_s11, 4  ;;  %s188_s8 = sshll.u32 %s2071_s13, 4  ;;  %s164_s5 = int_to_ptr.hbm [resolvable:$true] %s163_s5  ;;  %s189_s8 = int_to_ptr.hbm [resolvable:$true] %s188_s8 }
  0x43   :  { %143 = dma.hbm_to_vmem [thread:$0]  %s139_s23, 16, %s141_s24, [#allocation15]  }
  0x44   :  { %s1704_s1 = smov [#allocation19]   ;;  %s1705_s7 = smov [#allocation22]  }
  0x45   :  { %s165_s6 = sshll.u32 %s1704_s1, 4  ;;  %s190_s27 = sshll.u32 %s1705_s7, 4  ;;  %s166_s6 = int_to_ptr.vmem [resolvable:$true] %s165_s6  ;;  %s191_s27 = int_to_ptr.vmem [resolvable:$true] %s190_s27 }
  0x46   :  { %171 = dma.hbm_to_vmem [thread:$0]  %s164_s5, 512, %s166_s6, [#allocation18], %s1691_s26, %s1691_s26, %s1692_s2  }
  0x47   :  { %s211_s11 = sshll.u32 %s2073_s15, 4  ;;  %s235_s13 = sshll.u32 %s2075_s17, 4  ;;  %s212_s11 = int_to_ptr.hbm [resolvable:$true] %s211_s11  ;;  %s236_s13 = int_to_ptr.hbm [resolvable:$true] %s235_s13 }
  0x48   :  { %193 = dma.hbm_to_vmem [thread:$0]  %s189_s8, 128, %s191_s27, [#allocation21]  }
  0x49   :  { %s1706_s16 = smov [#allocation25]   ;;  %s1707_s3 = smov [#allocation28]  }
  0x4a   :  { %s213_s0 = sshll.u32 %s1706_s16, 4  ;;  %s237_s23 = sshll.u32 %s1707_s3, 4  ;;  %s214_s0 = int_to_ptr.vmem [resolvable:$true] %s213_s0  ;;  %s238_s23 = int_to_ptr.vmem [resolvable:$true] %s237_s23 }
  0x4b   :  { %219 = dma.hbm_to_vmem [thread:$0]  %s212_s11, 512, %s214_s0, [#allocation24], %s1691_s26, %s1691_s26, %s1692_s2  }
  0x4c   :  { %s263_s15 = sshll.u32 %s2078_s20, 4  ;;  %s1708_s17 = smov [#allocation31]   ;;  %s264_s15 = int_to_ptr.hbm [resolvable:$true] %s263_s15 }
  0x4d   :  { %243 = dma.hbm_to_vmem [thread:$0]  %s236_s13, 512, %s238_s23, [#allocation27], %s1691_s26, %s1691_s26, %s1692_s2  }
  0x4e   :  { %s265_s30 = sshll.u32 %s1708_s17, 4  ;;  %s266_s30 = int_to_ptr.vmem [resolvable:$true] %s265_s30 }
  0x4f   :  { %271 = dma.hbm_to_vmem [thread:$0]  %s264_s15, 2048, %s266_s30, [#allocation30], %s1691_s26, %s1691_s26, %s1692_s2  }
  0x50   :  { %1666 = dma.done.wait [#allocation3], 32  }
  0x51   :  { %1667 = vsyncadd [#allocation3], 4294967264 }
  0x52   :  { %1668 = dma.done.wait [#allocation6], 48  }
  0x53   :  { %1669 = vsyncadd [#allocation6], 4294967248 }
  0x54   :  { %1670 = dma.done.wait [#allocation9], 32  }
  0x55   :  { %1671 = vsyncadd [#allocation9], 4294967264 }
  0x56   :  { %1672 = dma.done.wait [#allocation12], 768  }
  0x57   :  { %1673 = vsyncadd [#allocation12], 4294966528 }
  0x58   :  { %1674 = dma.done.wait [#allocation15], 528  }
  0x59   :  { %1675 = vsyncadd [#allocation15], 4294966768 }
  0x5a   :  { %1676 = dma.done.wait [#allocation18], 1024  }
  0x5b   :  { %1677 = vsyncadd [#allocation18], 4294966272 }
  0x5c   :  { %1678 = dma.done.wait [#allocation21], 144  }
  0x5d   :  { %1679 = vsyncadd [#allocation21], 4294967152 }
  0x5e   :  { %1680 = dma.done.wait [#allocation24], 1024  }
  0x5f   :  { %1681 = vsyncadd [#allocation24], 4294966272 }
  0x60   :  { %1682 = dma.done.wait [#allocation27], 528  }
  0x61   :  { %1683 = vsyncadd [#allocation27], 4294966768 }
  0x62   :  { %1684 = dma.done.wait [#allocation30], 2560  }
  0x63   :  { %1685 = vsyncadd [#allocation30], 4294964736  ;;  %v1920_v0 = vld [vmem:[#allocation11 + $0x8] sm:$0xff]  ;;  %v1922_v1 = vld [vmem:[#allocation11] sm:$0xff]  ;;  %vm384_vm0 = vcmask 130048   ;;  %v1709_v7 = vmov 0.0  }
  0x64   :  { %v1924_v2 = vld [vmem:[#allocation13 + $0x18] sm:$0xff]  ;;  %402 = vmatpush.msra.mxu2 %v1920_v0  ;;  %v383_v3 = vld [vmem:[#allocation2] sm:$0x3]  ;;  %v1928_v4 = vld [vmem:[#allocation13 + $0x10] sm:$0xff]  ;;  %vm408_vm5 = vcmask 261120   ;;  %s1710_s20 = smov 64  }
  0x65   :  { %424 = vmatpush.msra.mxu1 %v1924_v2  ;;  %v1930_v5 = vld [vmem:[#allocation13 + $0x8] sm:$0xff]  ;;  %v1935_v6 = vld [vmem:[#allocation13] sm:$0xff]  ;;  %v1939_v8 = vld [vmem:[#allocation14 + $0x18] sm:$0xff]  ;;  %s1711_s26 = smov 96   ;;  %vm496_vm6 = vcmask 64512   ;;  %vm717_vm15 = vcmask 1040384  }
  0x66   :  { %403 = vmatpush.msra.mxu2 %v1922_v1  ;;  %v1941_v9 = vld [vmem:[#allocation14 + $0x10] sm:$0xff]  ;;  %915 = vmatpush.msra.mxu0 %v1939_v8  ;;  %v1945_v10 = vld [vmem:[#allocation14 + $0x8] sm:$0xff]  ;;  %v1949_v11 = vld [vmem:[#allocation14] sm:$0xff]  ;;  %s2101_s5 = sld [smem:[#allocation52_spill]]  ;;  %s1712_s1 = smov [#allocation32]  }
  0x67   :  { %425 = vmatpush.msra.mxu1 %v1928_v4  ;;  %1104 = vmatmul.msk.f32.vlgmr.msra.gmra.mxu2 %vm384_vm0, %v383_v3  ;;  %v1150_v14 = vld [vmem:[#allocation16] ss:$0 sm:$0xff]  ;;  %v363_v36 = vld [vmem:[%s2067_s9] sm:$0xff]  ;;  %v366_v41 = vld [vmem:[#allocation17 + $0x10] sm:$0xff]  ;;  %s2102_s8 = sld [smem:[#allocation53_spill]]  ;;  %s1083_s6 = sshll.u32 %s1712_s1, 4  ;;  %s1084_s6 = int_to_ptr.vmem [resolvable:$true] %s1083_s6 }
  0x68   :  { %473 = vmatpush.msrb.mxu2 %v1939_v8  ;;  %916 = vmatpush.msra.mxu0 %v1941_v9  ;;  %v495_v37 = vld [vmem:[#allocation7] sm:$0x3]  ;;  %v367_v38 = vld [vmem:[#allocation17 + $0x18] sm:$0xff]  ;;  %v374_v44 = vld [vmem:[#allocation23] sm:$0xff]  ;;  %s2103_s22 = sld [smem:[#allocation54_spill]] }
  0x69   :  { %426 = vmatpush.msra.mxu1 %v1930_v5  ;;  %515 = vmatpush.msra.mxu3 %v363_v36  ;;  %v377_v39 = vld [vmem:[#allocation23 + $0x18] sm:$0xff]  ;;  %v376_v40 = vld [vmem:[#allocation23 + $0x10] sm:$0xff]  ;;  %v375_v42 = vld [vmem:[#allocation23 + $0x8] sm:$0xff] }
  0x6a   :  { %474 = vmatpush.msrb.mxu2 %v1941_v9  ;;  %917 = vmatpush.msra.mxu0 %v1945_v10  ;;  %v365_v43 = vld [vmem:[#allocation17 + $0x8] sm:$0xff]  ;;  %v364_v45 = vld [vmem:[#allocation17] sm:$0xff]  ;;  %v371_v53 = vld [vmem:[#allocation19 + $0x18] sm:$0xff] }
  0x6b   :  { %427 = vmatpush.msra.mxu1 %v1935_v6  ;;  %1107 = vmatmul.msk.f32.vlgmr.msra.gmra.mxu3 %vm496_vm6, %v495_v37  ;;  %v370_v54 = vld [vmem:[#allocation19 + $0x10] sm:$0xff]  ;;  %v369_v55 = vld [vmem:[#allocation19 + $0x8] sm:$0xff]  ;;  %v368_v56 = vld [vmem:[#allocation19] sm:$0xff] }
  0x6c   :  { %428 = vmatmul.f32.vlgmr.msra.gmra.mxu1 %v1709_v7  ;;  %475 = vmatpush.msrb.mxu2 %v1945_v10  ;;  %v1978_v58 = vld [vmem:[#allocation20] ss:$0 sm:$0xff]  ;;  %v373_v61 = vld [vmem:[#allocation22] sm:$0xff] }
  0x6d   :  { %918 = vmatpush.msra.mxu0 %v1949_v11  ;;  %537 = vmatpush.msrb.mxu3 %v367_v38 }
  0x6e   :  { %476 = vmatpush.msrb.mxu2 %v1949_v11  ;;  %587 = vmatpush.msrb.mxu1 %v371_v53  ;;  %v713_v53 = vld [vmem:[#allocation5] sm:$0x1]  ;;  %s1085_s14 = sshll.u32 %s2103_s22, 4  ;;  %s1086_s14 = int_to_ptr.hbm [resolvable:$true] %s1085_s14 }
  0x6f   :  { %538 = vmatpush.msrb.mxu3 %v366_v41 }
  0x70   :  { %645 = vmatpush.msra.mxu2 %v377_v39  ;;  %588 = vmatpush.msrb.mxu1 %v370_v54 }
  0x71   :  { %539 = vmatpush.msrb.mxu3 %v365_v43 }
  0x72   :  { %646 = vmatpush.msra.mxu2 %v376_v40  ;;  %589 = vmatpush.msrb.mxu1 %v369_v55 }
  0x73   :  { %540 = vmatpush.msrb.mxu3 %v364_v45 }
  0x74   :  { %647 = vmatpush.msra.mxu2 %v375_v42  ;;  %590 = vmatpush.msrb.mxu1 %v368_v56 }
  0x76   :  { %648 = vmatpush.msra.mxu2 %v374_v44  ;;  %628 = vmatpush.msra.mxu1 %v373_v61 }
  0xe9   :  { %v429_v12 = vpop.f32.mrf.mxu1 }
  0xea   :  { %v405_v13 = vpop.f32.mrf.mxu2 }
  0xeb   :  { %v432_v15 = vadd.f32 %v429_v12, %v405_v13  ;;  %v456_v32 = vadd.f32 %v1150_v14, %v405_v13 }
  0xed   :  { %v436_v16 = vadd.f32 %v1150_v14, %v432_v15 }
  0xee   :  { %v1976_v52 = vpop.f32.mrf.mxu3 }
  0xef   :  { %v1105_v17 = vmul.f32 -1.442695, %v436_v16  ;;  %v569_v41 = vadd.f32 %v1978_v58, %v1976_v52 }
  0xf1   :  { %1152 = vpow2.f32 %v1105_v17 }
  0xf7   :  { %v1153_v18 = vpop.eup %1152 }
  0xf8   :  { %v440_v19 = vadd.f32 1.0, %v1153_v18  ;;  %v609_v18 = vld [vmem:[#allocation8] sm:$0x1] }
  0xfa   :  { %1154 = vrcp.f32 %v440_v19  ;;  %v452_v23 = vand.u32 2147483648, %v440_v19  ;;  %v450_v25 = vand.u32 2147483647, %v440_v19  ;;  %vm446_vm2 = vweird.f32 %v440_v19 }
  0xfc   :  { %v453_v27 = vor.u32 1.1754944e-38, %v452_v23  ;;  %vm451_vm4 = vcmp.eq.f32.partialorder %v450_v25, 8.507059e+37  ;;  %v378_v23 = vld [vmem:[#allocation25] sm:$0xff] }
 0x100   :  { %v1155_v20 = vpop.eup %1154 }
 0x101   :  { %v442_v21 = vmul.f32 %v1155_v20, %v440_v19  ;;  %vm447_vm1 = vweird.f32 %v1155_v20 }
 0x102   :  { %vm448_vm3 = vmor %vm446_vm2, %vm447_vm1  ;;  %vm719_vm1 = vcmask 517376  }
 0x103   :  { %v443_v22 = vsub.f32 1.0, %v442_v21  ;;  %v380_v21 = vld [vmem:[#allocation25 + $0x10] sm:$0xff] }
 0x105   :  { %v444_v24 = vmul.f32 %v1155_v20, %v443_v22  ;;  %v379_v22 = vld [vmem:[#allocation25 + $0x8] sm:$0xff] }
 0x107   :  { %v445_v26 = vadd.f32 %v1155_v20, %v444_v24 }
 0x109   :  { %v449_v28 = vsel %vm448_vm3, %v1155_v20, %v445_v26  ;;  %v381_v20 = vld [vmem:[#allocation25 + $0x18] sm:$0xff] }
 0x10a   :  { %v454_v29 = vsel %vm451_vm4, %v453_v27, %v449_v28  ;;  %691 = vmatpush.msra.mxu3 %v381_v20  ;;  %v382_v27 = vld [vmem:[#allocation26] sm:$0x1] }
 0x10b   :  { %v457_v30 = vmul.f32 0.0, %v454_v29  ;;  %v487_v46 = vsub.f32 1.0, %v454_v29 }
 0x10c   :  { %692 = vmatpush.msra.mxu3 %v380_v21 }
 0x10d   :  { %1106 = vmatmul.msk.f32.vlgmr.msrb.gmra.mxu2 %vm408_vm5, %v457_v30  ;;  %v488_v48 = vmul.f32 0.0, %v487_v46 }
 0x10e   :  { %819 = vmatpush.msrb.mxu2 %v1939_v8  ;;  %693 = vmatpush.msra.mxu3 %v379_v22 }
 0x110   :  { %820 = vmatpush.msrb.mxu2 %v1941_v9  ;;  %694 = vmatpush.msra.mxu3 %v378_v23 }
 0x112   :  { %821 = vmatpush.msrb.mxu2 %v1945_v10 }
 0x114   :  { %822 = vmatpush.msrb.mxu2 %v1949_v11 }
 0x190   :  { %v478_v31 = vpop.f32.mrf.mxu2 }
 0x191   :  { %482 = vrot.lane.b32.xlu0 %v478_v31, %s1710_s20 }
 0x203   :  { %v483_v33 = vpop.permute.xlu0 %482 }
 0x204   :  { %v485_v34 = vadd.f32 %v483_v33, %v456_v32 }
 0x206   :  { %1156 = vtanh.f32 %v485_v34 }
 0x20c   :  { %v1157_v35 = vpop.eup %1156 }
 0x20d   :  { %490 = vrot.lane.b32.xlu0 %v1157_v35, %s1711_s26 }
 0x27f   :  { %v491_v47 = vpop.permute.xlu0 %490 }
 0x280   :  { %v493_v49 = vmul.f32 %v491_v47, %v454_v29 }
 0x282   :  { %v1966_v50 = vadd.f32 %v493_v49, %v488_v48 }
 0x284   :  { %521 = vrot.lane.b32.xlu1 %v1966_v50, %s1711_s26 }
 0x2f6   :  { %v1970_v51 = vpop.permute.xlu1 %521 }
 0x2f7   :  { %1108 = vmatmul.msk.f32.vlgmr.msrb.gmra.mxu3 %vm408_vm5, %v1970_v51  ;;  %1112 = vmatmul.msk.f32.vlgmr.msra.gmra.mxu2 %vm408_vm5, %v1970_v51 }
 0x2f8   :  { %745 = vmatpush.msrb.mxu3 %v1920_v0 }
 0x2fa   :  { %746 = vmatpush.msrb.mxu3 %v1922_v1 }
 0x37a   :  { %v542_v57 = vpop.f32.mrf.mxu3  ;;  %v650_v24 = vpop.f32.mrf.mxu2 }
 0x37b   :  { %v545_v59 = vadd.f32 %v542_v57, %v1976_v52 }
 0x37d   :  { %v549_v60 = vadd.f32 %v1978_v58, %v545_v59 }
 0x37f   :  { %v1109_v62 = vmul.f32 -1.442695, %v549_v60 }
 0x381   :  { %1158 = vpow2.f32 %v1109_v62 }
 0x387   :  { %v1159_v63 = vpop.eup %1158 }
 0x388   :  { %v553_v3 = vadd.f32 1.0, %v1159_v63 }
 0x38a   :  { %1160 = vrcp.f32 %v553_v3  ;;  %v565_v10 = vand.u32 2147483648, %v553_v3  ;;  %v563_v12 = vand.u32 2147483647, %v553_v3  ;;  %vm559_vm8 = vweird.f32 %v553_v3 }
 0x38c   :  { %v566_v14 = vor.u32 1.1754944e-38, %v565_v10  ;;  %vm564_vm10 = vcmp.eq.f32.partialorder %v563_v12, 8.507059e+37 }
 0x390   :  { %v1161_v7 = vpop.eup %1160 }
 0x391   :  { %v555_v8 = vmul.f32 %v1161_v7, %v553_v3  ;;  %vm560_vm7 = vweird.f32 %v1161_v7 }
 0x392   :  { %vm561_vm9 = vmor %vm559_vm8, %vm560_vm7 }
 0x393   :  { %v556_v9 = vsub.f32 1.0, %v555_v8 }
 0x395   :  { %v557_v11 = vmul.f32 %v1161_v7, %v556_v9 }
 0x397   :  { %v558_v13 = vadd.f32 %v1161_v7, %v557_v11 }
 0x399   :  { %v562_v15 = vsel %vm561_vm9, %v1161_v7, %v558_v13  ;;  %v362_v13 = vld [vmem:[#allocation16] sm:$0x1] }
 0x39a   :  { %v1982_v16 = vsel %vm564_vm10, %v566_v14, %v562_v15 }
 0x39b   :  { %v571_v17 = vmul.f32 %v1982_v16, %v1970_v51 }
 0x39d   :  { %1110 = vmatmul.msk.f32.vlgmr.msrb.gmra.mxu1 %vm408_vm5, %v571_v17 }
 0x39e   :  { %768 = vmatpush.msrb.mxu1 %v1924_v2 }
 0x3a0   :  { %769 = vmatpush.msrb.mxu1 %v1928_v4 }
 0x3a2   :  { %770 = vmatpush.msrb.mxu1 %v1930_v5 }
 0x3a4   :  { %771 = vmatpush.msrb.mxu1 %v1935_v6 }
 0x3a5   :  { %1111 = vmatmul.msk.f32.vlgmr.msra.gmra.mxu1 %vm496_vm6, %v609_v18 }
 0x41a   :  { %v592_v19 = vpop.f32.mrf.mxu1 }
 0x41b   :  { %596 = vrot.lane.b32.xlu2 %v592_v19, %s1710_s20 }
 0x422   :  { %v630_v25 = vpop.f32.mrf.mxu1 }
 0x423   :  { %v653_v26 = vadd.f32 %v650_v24, %v630_v25  ;;  %v674_v46 = vadd.f32 %v630_v25, %v382_v27 }
 0x425   :  { %v654_v28 = vadd.f32 %v653_v26, %v382_v27 }
 0x427   :  { %v1113_v29 = vmul.f32 -1.442695, %v654_v28 }
 0x429   :  { %1162 = vpow2.f32 %v1113_v29 }
 0x42f   :  { %v1163_v30 = vpop.eup %1162 }
 0x430   :  { %v658_v31 = vadd.f32 1.0, %v1163_v30 }
 0x432   :  { %1164 = vrcp.f32 %v658_v31  ;;  %v670_v35 = vand.u32 2147483648, %v658_v31  ;;  %v668_v37 = vand.u32 2147483647, %v658_v31  ;;  %vm664_vm12 = vweird.f32 %v658_v31 }
 0x434   :  { %v671_v39 = vor.u32 1.1754944e-38, %v670_v35  ;;  %vm669_vm14 = vcmp.eq.f32.partialorder %v668_v37, 8.507059e+37 }
 0x438   :  { %v1165_v32 = vpop.eup %1164 }
 0x439   :  { %v660_v33 = vmul.f32 %v1165_v32, %v658_v31  ;;  %vm665_vm11 = vweird.f32 %v1165_v32 }
 0x43a   :  { %vm666_vm13 = vmor %vm664_vm12, %vm665_vm11 }
 0x43b   :  { %v661_v34 = vsub.f32 1.0, %v660_v33 }
 0x43d   :  { %v662_v36 = vmul.f32 %v1165_v32, %v661_v34 }
 0x43f   :  { %v663_v38 = vadd.f32 %v1165_v32, %v662_v36 }
 0x441   :  { %v667_v40 = vsel %vm666_vm13, %v1165_v32, %v663_v38 }
 0x442   :  { %v672_v0 = vsel %vm669_vm14, %v671_v39, %v667_v40 }
 0x443   :  { %v675_v1 = vmul.f32 %v672_v0, %v1970_v51  ;;  %v705_v54 = vsub.f32 1.0, %v672_v0 }
 0x445   :  { %1114 = vmatmul.msk.f32.vlgmr.msra.gmra.mxu3 %vm408_vm5, %v675_v1  ;;  %v706_v56 = vmul.f32 %v705_v54, %v1966_v50  ;;  %v940_v54 = vld [vmem:[#allocation28 + $0x10] sm:$0xff] }
 0x446   :  { %869 = vmatpush.msra.mxu3 %v1924_v2 }
 0x448   :  { %870 = vmatpush.msra.mxu3 %v1928_v4 }
 0x44a   :  { %871 = vmatpush.msra.mxu3 %v1930_v5  ;;  %v601_v5 = vsub.f32 1.0, %v1982_v16 }
 0x44c   :  { %872 = vmatpush.msra.mxu3 %v1935_v6  ;;  %v602_v49 = vmul.f32 %v601_v5, %v1966_v50 }
 0x44d   :  { %1115 = vmatmul.msk.f32.vlgmr.msrb.gmra.mxu3 %vm384_vm0, %v713_v53  ;;  %v941_v53 = vld [vmem:[#allocation28 + $0x18] sm:$0xff] }
 0x44e   :  { %988 = vmatpush.msra.mxu2 %v941_v53 }
 0x450   :  { %989 = vmatpush.msra.mxu2 %v940_v54 }
 0x475   :  { %v597_v42 = vpop.permute.xlu2 %596 }
 0x476   :  { %v599_v43 = vadd.f32 %v597_v42, %v569_v41 }
 0x478   :  { %1166 = vtanh.f32 %v599_v43 }
 0x47e   :  { %v1167_v44 = vpop.eup %1166 }
 0x47f   :  { %604 = vrot.lane.b32.xlu0 %v1167_v44, %s1711_s26 }
 0x4c8   :  { %v696_v45 = vpop.f32.mrf.mxu3 }
 0x4c9   :  { %700 = vrot.lane.b32.xlu1 %v696_v45, %s1710_s20 }
 0x4d0   :  { %v748_v11 = vpop.f32.mrf.mxu3 }
 0x4d1   :  { %v797_v5 = vadd.f32 %v748_v11, %v362_v13 }
 0x4f1   :  { %v605_v4 = vpop.permute.xlu0 %604 }
 0x4f2   :  { %v607_v6 = vmul.f32 %v605_v4, %v1982_v16 }
 0x4f4   :  { %v2009_v51 = vadd.f32 %v607_v6, %v602_v49 }
 0x4f6   :  { %v852_v52 = vrot.slane %v2009_v51, 1 }
 0x53b   :  { %v701_v2 = vpop.permute.xlu1 %700 }
 0x53c   :  { %v703_v47 = vadd.f32 %v701_v2, %v674_v46 }
 0x53e   :  { %1168 = vtanh.f32 %v703_v47 }
 0x544   :  { %v1169_v48 = vpop.eup %1168 }
 0x545   :  { %708 = vrot.lane.b32.xlu2 %v1169_v48, %s1711_s26 }
 0x54d   :  { %853 = vrot.lane.b32.xlu2 %v852_v52, %s1711_s26 }
 0x59f   :  { %v709_v55 = vpop.permute.xlu2 %708 }
 0x5a0   :  { %v711_v57 = vmul.f32 %v709_v55, %v672_v0  ;;  %v939_v55 = vld [vmem:[#allocation28 + $0x8] sm:$0xff] }
 0x5a1   :  { %990 = vmatpush.msra.mxu2 %v939_v55 }
 0x5a2   :  { %v712_v58 = vadd.f32 %v711_v57, %v706_v56  ;;  %v938_v56 = vld [vmem:[#allocation28] sm:$0xff]  ;;  %v827_v57 = vperm.slane %v797_v5, 0 }
 0x5a3   :  { %991 = vmatpush.msra.mxu2 %v938_v56 }
 0x5a4   :  { %v715_v59 = vrot.slane %v712_v58, 7 }
 0x5a6   :  { %v2019_v60 = vsel %vm717_vm15, %v2009_v51, %v715_v59 }
 0x5a7   :  { %800 = vrot.lane.b32.xlu0 %v2019_v60, %s1711_s26  ;;  %v720_v61 = vsel %vm719_vm1, %v2019_v60, 0.0  ;;  %v854_v62 = vpop.permute.xlu2 %853 }
 0x5a8   :  { %v721_v63 = vrot.slane %v720_v61, 4  ;;  %1119 = vmatmul.msk.f32.vlgmr.msra.gmra.mxu3 %vm408_vm5, %v854_v62 }
 0x5aa   :  { %v722_v50 = vadd.f32 %v721_v63, %v720_v61 }
 0x5ac   :  { %v723_v3 = vrot.slane %v722_v50, 2 }
 0x5ae   :  { %v724_v7 = vadd.f32 %v723_v3, %v722_v50 }
 0x5b0   :  { %v725_v8 = vrot.slane %v724_v7, 1 }
 0x5b2   :  { %v726_v9 = vadd.f32 %v725_v8, %v724_v7 }
 0x5b4   :  { %v727_v10 = vmul.f32 0.5, %v726_v9 }
 0x5b6   :  { %752 = vrot.lane.b32.xlu1 %v727_v10, %s1711_s26 }
 0x619   :  { %v801_v46 = vpop.permute.xlu0 %800 }
 0x628   :  { %v753_v12 = vpop.permute.xlu1 %752 }
 0x629   :  { %1116 = vmatmul.msk.f32.vlgmr.msrb.gmra.mxu1 %vm408_vm5, %v753_v12 }
 0x62b   :  { %v874_v14 = vpop.f32.mrf.mxu3 }
 0x62c   :  { %v877_v15 = vadd.f32 %v874_v14, %v748_v11 }
 0x62e   :  { %v878_v16 = vadd.f32 %v877_v15, %v362_v13 }
 0x630   :  { %v1120_v17 = vmul.f32 -1.442695, %v878_v16 }
 0x632   :  { %1170 = vpow2.f32 %v1120_v17 }
 0x638   :  { %v1171_v18 = vpop.eup %1170 }
 0x639   :  { %v882_v19 = vadd.f32 1.0, %v1171_v18 }
 0x63b   :  { %1172 = vrcp.f32 %v882_v19  ;;  %v894_v23 = vand.u32 2147483648, %v882_v19  ;;  %v892_v25 = vand.u32 2147483647, %v882_v19  ;;  %vm888_vm2 = vweird.f32 %v882_v19 }
 0x63d   :  { %v895_v27 = vor.u32 1.1754944e-38, %v894_v23  ;;  %vm893_vm4 = vcmp.eq.f32.partialorder %v892_v25, 8.507059e+37  ;;  %v943_v23 = vld [vmem:[#allocation29 + $0x8] sm:$0xff]  ;;  %v1013_v25 = vld [vmem:[#allocation31 + $0x70] sm:$0xff] }
 0x641   :  { %v1173_v20 = vpop.eup %1172 }
 0x642   :  { %v884_v21 = vmul.f32 %v1173_v20, %v882_v19  ;;  %vm889_vm0 = vweird.f32 %v1173_v20 }
 0x643   :  { %vm890_vm3 = vmor %vm888_vm2, %vm889_vm0 }
 0x644   :  { %v885_v22 = vsub.f32 1.0, %v884_v21  ;;  %v945_v21 = vld [vmem:[#allocation29 + $0x18] sm:$0xff] }
 0x645   :  { %963 = vmatpush.msra.mxu1 %v945_v21 }
 0x646   :  { %v886_v24 = vmul.f32 %v1173_v20, %v885_v22  ;;  %v944_v22 = vld [vmem:[#allocation29 + $0x10] sm:$0xff] }
 0x647   :  { %964 = vmatpush.msra.mxu1 %v944_v22 }
 0x648   :  { %v887_v26 = vadd.f32 %v1173_v20, %v886_v24  ;;  %v942_v24 = vld [vmem:[#allocation29] sm:$0xff] }
 0x649   :  { %965 = vmatpush.msra.mxu1 %v943_v23 }
 0x64a   :  { %v891_v28 = vsel %vm890_vm3, %v1173_v20, %v887_v26  ;;  %v1012_v26 = vld [vmem:[#allocation31 + $0x68] sm:$0xff] }
 0x64b   :  { %v896_v29 = vsel %vm893_vm4, %v895_v27, %v891_v28  ;;  %966 = vmatpush.msra.mxu1 %v942_v24  ;;  %v1016_v27 = vld [vmem:[%s2079_s21] sm:$0xff]  ;;  %v1011_v28 = vld [vmem:[#allocation31 + $0x60] sm:$0xff] }
 0x64c   :  { %v899_v30 = vmul.f32 %v896_v29, %v854_v62  ;;  %v929_v61 = vsub.f32 1.0, %v896_v29  ;;  %1035 = vmatpush.msrb.mxu3 %v1016_v27 }
 0x64e   :  { %1121 = vmatmul.msk.f32.vlgmr.msra.gmra.mxu0 %vm408_vm5, %v899_v30  ;;  %v931_v50 = vmul.f32 %v929_v61, %v852_v52  ;;  %v1009_v30 = vld [vmem:[#allocation31 + $0x50] sm:$0xff] }
 0x6a6   :  { %v773_v31 = vpop.f32.mrf.mxu1 }
 0x6a7   :  { %v776_v32 = vadd.f32 %v773_v31, %v748_v11  ;;  %v1008_v31 = vld [vmem:[#allocation31 + $0x48] sm:$0xff] }
 0x6a9   :  { %v777_v33 = vadd.f32 %v776_v32, %v362_v13  ;;  %v1007_v32 = vld [vmem:[#allocation31 + $0x40] sm:$0xff] }
 0x6ab   :  { %v1117_v34 = vmul.f32 -1.442695, %v777_v33  ;;  %v1006_v33 = vld [vmem:[#allocation31 + $0x38] sm:$0xff] }
 0x6ad   :  { %1174 = vpow2.f32 %v1117_v34  ;;  %v1005_v34 = vld [vmem:[#allocation31 + $0x30] sm:$0xff] }
 0x6b3   :  { %v1175_v35 = vpop.eup %1174 }
 0x6b4   :  { %v781_v36 = vadd.f32 1.0, %v1175_v35  ;;  %v1004_v35 = vld [vmem:[#allocation31 + $0x28] sm:$0xff] }
 0x6b6   :  { %1176 = vrcp.f32 %v781_v36  ;;  %v793_v40 = vand.u32 2147483648, %v781_v36  ;;  %v791_v1 = vand.u32 2147483647, %v781_v36  ;;  %vm787_vm8 = vweird.f32 %v781_v36 }
 0x6b8   :  { %v794_v42 = vor.u32 1.1754944e-38, %v793_v40  ;;  %vm792_vm10 = vcmp.eq.f32.partialorder %v791_v1, 8.507059e+37  ;;  %v1001_v40 = vld [vmem:[#allocation31 + $0x10] sm:$0xff]  ;;  %v999_v1 = vld [vmem:[#allocation31] sm:$0xff] }
 0x6bc   :  { %v1177_v37 = vpop.eup %1176 }
 0x6bd   :  { %v783_v38 = vmul.f32 %v1177_v37, %v781_v36  ;;  %vm788_vm7 = vweird.f32 %v1177_v37  ;;  %v1003_v36 = vld [vmem:[#allocation31 + $0x20] sm:$0xff] }
 0x6be   :  { %vm789_vm9 = vmor %vm787_vm8, %vm788_vm7 }
 0x6bf   :  { %v784_v39 = vsub.f32 1.0, %v783_v38  ;;  %v1002_v38 = vld [vmem:[#allocation31 + $0x18] sm:$0xff] }
 0x6c1   :  { %v785_v0 = vmul.f32 %v1177_v37, %v784_v39  ;;  %v1015_v39 = vld [vmem:[#allocation10] sm:$0x1] }
 0x6c2   :  { %1124 = vmatmul.msk.f32.vlgmr.msrb.gmra.mxu3 %vm496_vm6, %v1015_v39 }
 0x6c3   :  { %v786_v41 = vadd.f32 %v1177_v37, %v785_v0  ;;  %v1000_v0 = vld [vmem:[#allocation31 + $0x8] sm:$0xff] }
 0x6c5   :  { %v790_v43 = vsel %vm789_vm9, %v1177_v37, %v786_v41 }
 0x6c6   :  { %v795_v44 = vsel %vm792_vm10, %v794_v42, %v790_v43  ;;  %v996_v43 = vld [vmem:[%s2101_s5] sm:$0x1] }
 0x6c7   :  { %v798_v45 = vperm.slane %v795_v44, 0  ;;  %v834_v9 = vsub.f32 1.0, %v795_v44 }
 0x6c9   :  { %v803_v2 = vmul.f32 %v801_v46, %v798_v45  ;;  %v835_v10 = vperm.slane %v834_v9, 0 }
 0x6cb   :  { %1118 = vmatmul.msk.f32.vlgmr.msrb.gmra.mxu2 %vm408_vm5, %v803_v2  ;;  %v920_v47 = vpop.f32.mrf.mxu0  ;;  %v836_v12 = vmul.f32 %v835_v10, %v2019_v60  ;;  %v1014_v60 = vld [vmem:[#allocation31 + $0x78] sm:$0xff] }
 0x6cc   :  { %924 = vrot.lane.b32.xlu2 %v920_v47, %s1710_s20  ;;  %1040 = vmatpush.msrb.mxu0 %v1014_v60 }
 0x6ce   :  { %1041 = vmatpush.msrb.mxu0 %v1013_v25 }
 0x6d0   :  { %1042 = vmatpush.msrb.mxu0 %v1012_v26 }
 0x6d2   :  { %1043 = vmatpush.msrb.mxu0 %v1011_v28 }
 0x726   :  { %v925_v4 = vpop.permute.xlu2 %924 }
 0x727   :  { %v927_v6 = vadd.f32 %v925_v4, %v797_v5  ;;  %v1060_v4 = vld [vmem:[%s2102_s8] sm:$0x1] }
 0x729   :  { %1178 = vtanh.f32 %v927_v6 }
 0x72f   :  { %v1179_v49 = vpop.eup %1178 }
 0x745   :  { %v1037_v2 = vpop.f32.mrf.mxu3 }
 0x74e   :  { %v824_v48 = vpop.f32.mrf.mxu2 }
 0x74f   :  { %829 = vrot.lane.b32.xlu1 %v824_v48, %s1710_s20 }
 0x757   :  { %933 = vrot.lane.b32.xlu1 %v1179_v49, %s1711_s26 }
 0x7c1   :  { %v830_v58 = vpop.permute.xlu1 %829 }
 0x7c2   :  { %v832_v59 = vadd.f32 %v830_v58, %v827_v57 }
 0x7c4   :  { %1180 = vtanh.f32 %v832_v59 }
 0x7c9   :  { %v934_v62 = vpop.permute.xlu1 %933 }
 0x7ca   :  { %v1181_v63 = vpop.eup %1180  ;;  %v936_v3 = vmul.f32 %v934_v62, %v896_v29  ;;  %v1010_v29 = vld [vmem:[#allocation31 + $0x58] sm:$0xff] }
 0x7cb   :  { %838 = vrot.lane.b32.xlu0 %v1181_v63, %s1711_s26  ;;  %1044 = vmatpush.msrb.mxu0 %v1010_v29 }
 0x7cc   :  { %v937_v7 = vadd.f32 %v936_v3, %v931_v50 }
 0x7cd   :  { %1045 = vmatpush.msrb.mxu0 %v1009_v30 }
 0x7ce   :  { %972 = vrot.lane.b32.xlu2 %v937_v7, %s1711_s26 }
 0x7cf   :  { %1046 = vmatpush.msrb.mxu0 %v1008_v31 }
 0x7d1   :  { %1047 = vmatpush.msrb.mxu0 %v1007_v32 }
 0x7d3   :  { %1048 = vmatpush.msrb.mxu0 %v1006_v33 }
 0x7d5   :  { %1049 = vmatpush.msrb.mxu0 %v1005_v34 }
 0x7d7   :  { %1050 = vmatpush.msrb.mxu0 %v1004_v35 }
 0x7d9   :  { %1051 = vmatpush.msrb.mxu0 %v1003_v36 }
 0x7db   :  { %1052 = vmatpush.msrb.mxu0 %v1002_v38 }
 0x7dd   :  { %1053 = vmatpush.msrb.mxu0 %v1001_v40 }
 0x7df   :  { %1054 = vmatpush.msrb.mxu0 %v1000_v0 }
 0x7e1   :  { %1055 = vmatpush.msrb.mxu0 %v999_v1 }
 0x828   :  { %v973_v8 = vpop.permute.xlu2 %972 }
 0x829   :  { %1123 = vmatmul.msk.f32.vlgmr.msra.gmra.mxu2 %vm408_vm5, %v973_v8 }
 0x83d   :  { %v839_v11 = vpop.permute.xlu0 %838 }
 0x83e   :  { %v841_v13 = vmul.f32 %v839_v11, %v798_v45 }
 0x840   :  { %v842_v14 = vadd.f32 %v841_v13, %v836_v12 }
 0x842   :  { %v843_v15 = vsel %vm719_vm1, %v842_v14, 0.0 }
 0x843   :  { %v844_v51 = vrot.slane %v843_v15, 4 }
 0x845   :  { %v845_v52 = vadd.f32 %v844_v51, %v843_v15 }
 0x847   :  { %v846_v16 = vrot.slane %v845_v52, 2 }
 0x849   :  { %v847_v17 = vadd.f32 %v846_v16, %v845_v52 }
 0x84b   :  { %v848_v18 = vrot.slane %v847_v17, 1 }
 0x84d   :  { %v849_v19 = vadd.f32 %v848_v18, %v847_v17 }
 0x84f   :  { %v850_v20 = vmul.f32 0.5, %v849_v19 }
 0x851   :  { %947 = vrot.lane.b32.xlu0 %v850_v20, %s1711_s26 }
 0x8ac   :  { %v993_v41 = vpop.f32.mrf.mxu2 }
 0x8c3   :  { %v948_v37 = vpop.permute.xlu0 %947 }
 0x8c4   :  { %1122 = vmatmul.msk.f32.vlgmr.msra.gmra.mxu1 %vm408_vm5, %v948_v37 }
 0x941   :  { %v968_v42 = vpop.f32.mrf.mxu1 }
 0x942   :  { %v994_v44 = vadd.f32 %v993_v41, %v968_v42 }
 0x944   :  { %v997_v45 = vadd.f32 %v996_v43, %v994_v44 }
 0x946   :  { %v998_v46 = vmax.f32 %v997_v45, 0.0 }
 0x948   :  { %1056 = vmatmul.f32.vlgmr.msrb.gmra.mxu0 %v998_v46 }
 0x9c5   :  { %v1057_v47 = vpop.f32.mrf.mxu0 }
 0x9c6   :  { %v1058_v5 = vadd.f32 %v1057_v47, %v1037_v2 }
 0x9c8   :  { %v1061_v6 = vadd.f32 %v1060_v4, %v1058_v5 }
 0x9ca   :  { %v1062_v48 = vsel %vm717_vm15, %v1061_v6, -inf }
 0x9cb   :  { %1063 = vmax.xlane.f32.xlu1 %v1062_v48 }
 0xa3e   :  { %v1064_v49 = vpop.xlane.xlu1 %1063 }
 0xa3f   :  { %v1065_v53 = vsub.f32 %v1061_v6, %v1064_v49 }
 0xa41   :  { %v1066_v54 = vmul.f32 1.442695, %v1065_v53 }
 0xa43   :  { %1182 = vpow2.f32 %v1066_v54 }
 0xa49   :  { %v1183_v55 = vpop.eup %1182 }
 0xa4a   :  { %v1068_v56 = vsel %vm717_vm15, %v1183_v55, 0.0 }
 0xa4b   :  { %1069 = vadd.xlane.f32.xlu2 %v1068_v56 }
 0xabe   :  { %v1070_v57 = vpop.xlane.xlu2 %1069 }
 0xabf   :  { %1184 = vrcp.f32 %v1070_v57 }
 0xac5   :  { %v1185_v58 = vpop.eup %1184 }
 0xac6   :  { %v1072_v59 = vmul.f32 %v1185_v58, %v1183_v55 }
 0xac8   :  { %v1074_v61 = vrot.slane %v1072_v59, 7 }
 0xaca   :  { %v1076_v62 = vsel %vm717_vm15, %v998_v46, %v1074_v61 }
 0xacb   :  { %1077 = vst [vmem:[#allocation32] sm:$0x3] %v1076_v62 }
 0xacc   :  { %1088 = dma.vmem_to_hbm [thread:$0]  %s1084_s6, 32, %s1086_s14, [#allocation4]  }
 0xacd   :  { %1686 = dma.done.wait [#allocation4], 32  }
 0xace   :  { %1687 = vsyncadd [#allocation4], 4294967264 }
 0xacf   :  { %1093 = vsyncpa [#allocation3], 1 }
 0xad0   :  { %1094 = vsyncpa [#allocation6], 1 }
 0xad1   :  { %1095 = vsyncpa [#allocation9], 1 }
 0xad2   :  { %1096 = vsyncpa [#allocation12], 1 }
 0xad3   :  { %1097 = vsyncpa [#allocation15], 1 }
 0xad4   :  { %1098 = vsyncpa [#allocation18], 1 }
 0xad5   :  { %1099 = vsyncpa [#allocation21], 1 }
 0xad6   :  { %1100 = vsyncpa [#allocation24], 1 }
 0xad7   :  { %1101 = vsyncpa [#allocation27], 1 }
 0xad8   :  { %1102 = vsyncpa [#allocation30], 1 }
 0xad9   :  { %1103 = vsyncpa [#allocation4], 1 }

</bundles_post_ra>
